<compile_context>
chip_gen: v6e
topology: v6e:2x2x1
jax: 0.10.0
libtpu: 0.0.40
codegen_flags: <defaults>
</compile_context>

<pallas_src>
import math

import jax
import jax.numpy as jnp
from jax import lax
from jax.experimental import pallas as pl
from jax.experimental.pallas import tpu as pltpu

# Config: _BlockRNNModule(name="LSTM", input_size=4, hidden_dim=32,
#   num_layers=2, output_chunk_length=4, target_size=1,
#   num_layers_out_fc=[16], dropout=0.0); input_chunk_length (seq) = 8.
BATCH = 2
PAD_B = 8            # sublane-padded batch (vreg is 8 x 128)
SEQ = 8
INPUT_SIZE = 4
HIDDEN = 32
NUM_LAYERS = 2
OUT_LEN = 4
TARGET = 1
FC_HIDDEN = 16


def _block_rnn_kernel(x_ref,        # (SEQ*PAD_B, INPUT_SIZE) time-major, zero-padded rows
                      wih0_ref,     # (INPUT_SIZE, 4H)   g-gate cols pre-scaled by 2
                      b0_ref,       # (1, 4H)            g-gate cols pre-scaled by 2
                      whh0_ref,     # (H, 4H)            g-gate cols pre-scaled by 2
                      wih1_ref,     # (H, 4H)            g-gate cols pre-scaled by 2
                      whh1_ref,     # (H, 4H)            g-gate cols pre-scaled by 2
                      b1_ref,       # (1, 4H)            g-gate cols pre-scaled by 2
                      wfc_ref,      # (H, OUT_LEN*TARGET) collapsed FC
                      bfc_ref,      # (1, OUT_LEN*TARGET)
                      out_ref):     # (PAD_B, OUT_LEN*TARGET)
    H = HIDDEN

    # ---- Layer-0 input projection for ALL timesteps in one MXU call (bias
    #      folded in), outside the serial recurrence. (64, 4) @ (4, 128). ----
    xproj = (jnp.dot(x_ref[...], wih0_ref[...],
                     preferred_element_type=jnp.float32)
             + b0_ref[...])                              # (SEQ*PAD_B, 4H)

    whh0 = whh0_ref[...]
    wih1 = wih1_ref[...]
    whh1 = whh1_ref[...]
    # Hoisted bias broadcast (JAX does not CSE broadcast_in_dim inside loops).
    b1 = jnp.broadcast_to(b1_ref[...], (PAD_B, 4 * H))

    def lstm_cell(gates, c):
        # One sigmoid over the whole (PAD_B, 4H) vreg; the g gate's
        # pre-activation columns were scaled by 2 offline, so
        # 2*sigmoid(2x) - 1 == tanh(x).  Two EUP pushes per cell total.
        sg = jax.nn.sigmoid(gates)
        i = sg[:, 0 * H:1 * H]
        f = sg[:, 1 * H:2 * H]
        g = 2.0 * sg[:, 2 * H:3 * H] - 1.0
        o = sg[:, 3 * H:4 * H]
        c_new = f * c + i * g
        h_new = o * jnp.tanh(c_new)
        return h_new, c_new

    zeros = jnp.zeros((PAD_B, H), jnp.float32)
    h0, c0, h1, c1 = zeros, zeros, zeros, zeros

    # ---- Fused two-layer recurrence, fully unrolled (SEQ=8 is static).
    #      All xproj slices are 8-sublane aligned (t*8 : t*8+8). ----
    for t in range(SEQ):
        # Layer 0: only the recurrent matmul remains on the serial path.
        g0 = xproj[t * PAD_B:(t + 1) * PAD_B, :] + jnp.dot(
            h0, whh0, preferred_element_type=jnp.float32)
        h0, c0 = lstm_cell(g0, c0)

        # Layer 1: two small dots + VPU add (no per-step lane concat).  The
        # h1 @ whh1 term only depends on the previous step, so it can issue
        # while layer 0's cell math for this step is still in flight.
        g1 = (jnp.dot(h1, whh1, preferred_element_type=jnp.float32)
              + jnp.dot(h0, wih1, preferred_element_type=jnp.float32)
              + b1)
        h1, c1 = lstm_cell(g1, c1)

    # ---- Collapsed FC decoder (no activation between the Linear layers). ----
    out_ref[...] = (jnp.dot(h1, wfc_ref[...],
                            preferred_element_type=jnp.float32)
                    + bfc_ref[...])


def _prepare_kernel_params(p):
    """Fold / pre-transpose PyTorch-layout params into kernel layout.

    The g-gate (cell-candidate) pre-activation columns [2H:3H] are scaled by 2
    so the kernel can use tanh(x) = 2*sigmoid(2x) - 1 (one fewer EUP push).
    """
    H = HIDDEN

    def scale_g(w):   # w: (..., 4H)
        return w.at[..., 2 * H:3 * H].multiply(2.0)

    wih0_t = scale_g(p["wih0"].T)                                   # (IN, 4H)
    b0 = scale_g((p["bih0"] + p["bhh0"])[None, :])                  # (1, 4H)
    whh0_t = scale_g(p["whh0"].T)                                   # (H, 4H)
    wih1_t = scale_g(p["wih1"].T)                                   # (H, 4H)
    whh1_t = scale_g(p["whh1"].T)                                   # (H, 4H)
    b1 = scale_g((p["bih1"] + p["bhh1"])[None, :])                  # (1, 4H)
    # Collapse Linear(H,16) -> Linear(16,OUT) (no inter-layer activation).
    wfc = p["wfc0"].T @ p["wfc1"].T                                 # (H, OUT)
    bfc = (p["bfc0"] @ p["wfc1"].T + p["bfc1"])[None, :]            # (1, OUT)
    return (wih0_t, b0, whh0_t, wih1_t, whh1_t, b1, wfc, bfc)


def make_block_rnn_forward(params):
    """Prepare kernel-layout params once and return a jitted forward fn.

    The returned fn maps x: (batch, seq, input_size) -> (batch, out_len, target).
    All weight prep happens here (once); per call there is a single jitted
    dispatch containing the transpose/pad/reshape and the pallas_call.
    """
    kparams = _prepare_kernel_params(params)

    vmem = pl.BlockSpec(memory_space=pltpu.MemorySpace.VMEM)
    call = pl.pallas_call(
        _block_rnn_kernel,
        out_shape=jax.ShapeDtypeStruct((PAD_B, OUT_LEN * TARGET), jnp.float32),
        in_specs=[vmem] * (1 + len(kparams)),
        out_specs=vmem,
    )

    @jax.jit
    def forward(x):
        # batch_first -> time-major, zero-padded to 8 sublanes, flattened so the
        # kernel's per-step slices are tile-aligned views.
        x_tm = jnp.transpose(x, (1, 0, 2)).astype(jnp.float32)     # (SEQ, B, IN)
        x_pad = jnp.zeros((SEQ, PAD_B, INPUT_SIZE), jnp.float32)
        x_pad = x_pad.at[:, :BATCH, :].set(x_tm)
        x_flat = x_pad.reshape(SEQ * PAD_B, INPUT_SIZE)
        out_pad = call(x_flat, *kparams)                           # (PAD_B, OUT)
        return out_pad[:BATCH].reshape(BATCH, OUT_LEN, TARGET)

    return forward


def init_params(key):
    """Deterministic synthetic PyTorch-layout params, U(-1/sqrt(H), 1/sqrt(H))."""
    scale = 1.0 / math.sqrt(HIDDEN)
    ks = jax.random.split(key, 12)

    def u(k, shape):
        return jax.random.uniform(k, shape, jnp.float32, -scale, scale)

    return dict(
        wih0=u(ks[0], (4 * HIDDEN, INPUT_SIZE)),
        whh0=u(ks[1], (4 * HIDDEN, HIDDEN)),
        bih0=u(ks[2], (4 * HIDDEN,)),
        bhh0=u(ks[3], (4 * HIDDEN,)),
        wih1=u(ks[4], (4 * HIDDEN, HIDDEN)),
        whh1=u(ks[5], (4 * HIDDEN, HIDDEN)),
        bih1=u(ks[6], (4 * HIDDEN,)),
        bhh1=u(ks[7], (4 * HIDDEN,)),
        wfc0=u(ks[8], (FC_HIDDEN, HIDDEN)),
        bfc0=u(ks[9], (FC_HIDDEN,)),
        wfc1=u(ks[10], (OUT_LEN * TARGET, FC_HIDDEN)),
        bfc1=u(ks[11], (OUT_LEN * TARGET,)),
    )


def reference_forward(x, p):
    """Pure-JAX reference of the PyTorch forward (PyTorch-layout params)."""

    def lstm_layer(seq_in, wih, whh, bih, bhh):   # seq_in: (seq, batch, in)
        def step(carry, xt):
            h, c = carry
            gates = xt @ wih.T + h @ whh.T + bih + bhh
            i = jax.nn.sigmoid(gates[:, :HIDDEN])
            f = jax.nn.sigmoid(gates[:, HIDDEN:2 * HIDDEN])
            g = jnp.tanh(gates[:, 2 * HIDDEN:3 * HIDDEN])
            o = jax.nn.sigmoid(gates[:, 3 * HIDDEN:])
            c = f * c + i * g
            h = o * jnp.tanh(c)
            return (h, c), h

        init = (jnp.zeros((BATCH, HIDDEN), jnp.float32),
                jnp.zeros((BATCH, HIDDEN), jnp.float32))
        (h_last, _), hs = lax.scan(step, init, seq_in)
        return hs, h_last

    x_tm = jnp.transpose(x, (1, 0, 2)).astype(jnp.float32)
    hs0, _ = lstm_layer(x_tm, p["wih0"], p["whh0"], p["bih0"], p["bhh0"])
    _, h_last = lstm_layer(hs0, p["wih1"], p["whh1"], p["bih1"], p["bhh1"])
    y = h_last @ p["wfc0"].T + p["bfc0"]
    y = y @ p["wfc1"].T + p["bfc1"]
    return y.reshape(BATCH, OUT_LEN, TARGET)


if __name__ == "__main__":
    key = jax.random.PRNGKey(0)
    kx, kp = jax.random.split(key)
    x = jax.random.normal(kx, (BATCH, SEQ, INPUT_SIZE), jnp.float32)
    params = init_params(kp)

    forward = make_block_rnn_forward(params)   # one-time param prep + jit
    out = jax.block_until_ready(forward(x))
    ref = jax.block_until_ready(reference_forward(x, params))

    assert out.shape == (BATCH, OUT_LEN, TARGET), out.shape
    assert jnp.allclose(out, ref, atol=1e-5, rtol=1e-5), (out, ref)
    print("KERNEL_OK")
</pallas_src>

<mosaic_0001>
module attributes {stable_mosaic.version = 11 : i64} {
  func.func @_block_rnn_kernel(%arg0: memref<64x4xf32, #tpu.memory_space<vmem>>, %arg1: memref<4x128xf32, #tpu.memory_space<vmem>>, %arg2: memref<1x128xf32, #tpu.memory_space<vmem>>, %arg3: memref<32x128xf32, #tpu.memory_space<vmem>>, %arg4: memref<32x128xf32, #tpu.memory_space<vmem>>, %arg5: memref<32x128xf32, #tpu.memory_space<vmem>>, %arg6: memref<1x128xf32, #tpu.memory_space<vmem>>, %arg7: memref<32x4xf32, #tpu.memory_space<vmem>>, %arg8: memref<1x4xf32, #tpu.memory_space<vmem>>, %arg9: memref<8x4xf32, #tpu.memory_space<vmem>>) attributes {dimension_semantics = [], scalar_prefetch = 0 : i64, scratch_operands = 0 : i64, tpu.core_type = #tpu.core_type<tc>} {
    %c0 = arith.constant 0 : index
    %c0_0 = arith.constant 0 : index
    %0 = vector.load %arg0[%c0, %c0_0] : memref<64x4xf32, #tpu.memory_space<vmem>>, vector<64x4xf32>
    %c0_1 = arith.constant 0 : index
    %c0_2 = arith.constant 0 : index
    %1 = vector.load %arg1[%c0_1, %c0_2] : memref<4x128xf32, #tpu.memory_space<vmem>>, vector<4x128xf32>
    %cst = arith.constant dense<0.000000e+00> : vector<64x128xf32>
    %2 = tpu.matmul %0, %1, %cst {dimension_numbers = #tpu.dot_dimension_numbers<[1], [0], [0], [1], [0, 0, 1, 1], [], []>} : vector<64x4xf32>, vector<4x128xf32>, vector<64x128xf32> -> vector<64x128xf32>
    %c0_3 = arith.constant 0 : index
    %c0_4 = arith.constant 0 : index
    %3 = vector.load %arg2[%c0_3, %c0_4] : memref<1x128xf32, #tpu.memory_space<vmem>>, vector<1x128xf32>
    %4 = vector.broadcast %3 : vector<1x128xf32> to vector<64x128xf32>
    %5 = arith.addf %2, %4 : vector<64x128xf32>
    %c0_5 = arith.constant 0 : index
    %c0_6 = arith.constant 0 : index
    %6 = vector.load %arg3[%c0_5, %c0_6] : memref<32x128xf32, #tpu.memory_space<vmem>>, vector<32x128xf32>
    %c0_7 = arith.constant 0 : index
    %c0_8 = arith.constant 0 : index
    %7 = vector.load %arg4[%c0_7, %c0_8] : memref<32x128xf32, #tpu.memory_space<vmem>>, vector<32x128xf32>
    %c0_9 = arith.constant 0 : index
    %c0_10 = arith.constant 0 : index
    %8 = vector.load %arg5[%c0_9, %c0_10] : memref<32x128xf32, #tpu.memory_space<vmem>>, vector<32x128xf32>
    %c0_11 = arith.constant 0 : index
    %c0_12 = arith.constant 0 : index
    %9 = vector.load %arg6[%c0_11, %c0_12] : memref<1x128xf32, #tpu.memory_space<vmem>>, vector<1x128xf32>
    %10 = vector.shape_cast %9 : vector<1x128xf32> to vector<1x128xf32>
    %11 = vector.broadcast %10 : vector<1x128xf32> to vector<8x128xf32>
    %cst_13 = arith.constant 0.000000e+00 : f32
    %12 = vector.broadcast %cst_13 : f32 to vector<8x32xf32>
    %13 = vector.extract_strided_slice %5 {offsets = [0, 0], sizes = [8, 128], strides = [1, 1]} : vector<64x128xf32> to vector<8x128xf32>
    %cst_14 = arith.constant dense<0.000000e+00> : vector<8x128xf32>
    %14 = tpu.matmul %12, %6, %cst_14 {dimension_numbers = #tpu.dot_dimension_numbers<[1], [0], [0], [1], [0, 0, 1, 1], [], []>} : vector<8x32xf32>, vector<32x128xf32>, vector<8x128xf32> -> vector<8x128xf32>
    %15 = arith.addf %13, %14 : vector<8x128xf32>
    %16 = arith.negf %15 : vector<8x128xf32>
    %17 = math.exp %16 : vector<8x128xf32>
    %cst_15 = arith.constant 1.000000e+00 : f32
    %18 = vector.broadcast %cst_15 : f32 to vector<8x128xf32>
    %19 = arith.addf %18, %17 : vector<8x128xf32>
    %20 = arith.divf %18, %19 : vector<8x128xf32>
    %21 = vector.extract_strided_slice %20 {offsets = [0, 0], sizes = [8, 32], strides = [1, 1]} : vector<8x128xf32> to vector<8x32xf32>
    %22 = vector.extract_strided_slice %20 {offsets = [0, 32], sizes = [8, 32], strides = [1, 1]} : vector<8x128xf32> to vector<8x32xf32>
    %23 = vector.extract_strided_slice %20 {offsets = [0, 64], sizes = [8, 32], strides = [1, 1]} : vector<8x128xf32> to vector<8x32xf32>
    %cst_16 = arith.constant 2.000000e+00 : f32
    %24 = vector.broadcast %cst_16 : f32 to vector<8x32xf32>
    %25 = arith.mulf %24, %23 : vector<8x32xf32>
    %cst_17 = arith.constant 1.000000e+00 : f32
    %26 = vector.broadcast %cst_17 : f32 to vector<8x32xf32>
    %27 = arith.subf %25, %26 : vector<8x32xf32>
    %28 = vector.extract_strided_slice %20 {offsets = [0, 96], sizes = [8, 32], strides = [1, 1]} : vector<8x128xf32> to vector<8x32xf32>
    %29 = arith.mulf %22, %12 : vector<8x32xf32>
    %30 = arith.mulf %21, %27 : vector<8x32xf32>
    %31 = arith.addf %29, %30 : vector<8x32xf32>
    %32 = math.tanh %31 : vector<8x32xf32>
    %33 = arith.mulf %28, %32 : vector<8x32xf32>
    %cst_18 = arith.constant dense<0.000000e+00> : vector<8x128xf32>
    %34 = tpu.matmul %12, %8, %cst_18 {dimension_numbers = #tpu.dot_dimension_numbers<[1], [0], [0], [1], [0, 0, 1, 1], [], []>} : vector<8x32xf32>, vector<32x128xf32>, vector<8x128xf32> -> vector<8x128xf32>
    %cst_19 = arith.constant dense<0.000000e+00> : vector<8x128xf32>
    %35 = tpu.matmul %33, %7, %cst_19 {dimension_numbers = #tpu.dot_dimension_numbers<[1], [0], [0], [1], [0, 0, 1, 1], [], []>} : vector<8x32xf32>, vector<32x128xf32>, vector<8x128xf32> -> vector<8x128xf32>
    %36 = arith.addf %34, %35 : vector<8x128xf32>
    %37 = arith.addf %36, %11 : vector<8x128xf32>
    %38 = arith.negf %37 : vector<8x128xf32>
    %39 = math.exp %38 : vector<8x128xf32>
    %cst_20 = arith.constant 1.000000e+00 : f32
    %40 = vector.broadcast %cst_20 : f32 to vector<8x128xf32>
    %41 = arith.addf %40, %39 : vector<8x128xf32>
    %42 = arith.divf %40, %41 : vector<8x128xf32>
    %43 = vector.extract_strided_slice %42 {offsets = [0, 0], sizes = [8, 32], strides = [1, 1]} : vector<8x128xf32> to vector<8x32xf32>
    %44 = vector.extract_strided_slice %42 {offsets = [0, 32], sizes = [8, 32], strides = [1, 1]} : vector<8x128xf32> to vector<8x32xf32>
    %45 = vector.extract_strided_slice %42 {offsets = [0, 64], sizes = [8, 32], strides = [1, 1]} : vector<8x128xf32> to vector<8x32xf32>
    %cst_21 = arith.constant 2.000000e+00 : f32
    %46 = vector.broadcast %cst_21 : f32 to vector<8x32xf32>
    %47 = arith.mulf %46, %45 : vector<8x32xf32>
    %cst_22 = arith.constant 1.000000e+00 : f32
    %48 = vector.broadcast %cst_22 : f32 to vector<8x32xf32>
    %49 = arith.subf %47, %48 : vector<8x32xf32>
    %50 = vector.extract_strided_slice %42 {offsets = [0, 96], sizes = [8, 32], strides = [1, 1]} : vector<8x128xf32> to vector<8x32xf32>
    %51 = arith.mulf %44, %12 : vector<8x32xf32>
    %52 = arith.mulf %43, %49 : vector<8x32xf32>
    %53 = arith.addf %51, %52 : vector<8x32xf32>
    %54 = math.tanh %53 : vector<8x32xf32>
    %55 = arith.mulf %50, %54 : vector<8x32xf32>
    %56 = vector.extract_strided_slice %5 {offsets = [8, 0], sizes = [8, 128], strides = [1, 1]} : vector<64x128xf32> to vector<8x128xf32>
    %cst_23 = arith.constant dense<0.000000e+00> : vector<8x128xf32>
    %57 = tpu.matmul %33, %6, %cst_23 {dimension_numbers = #tpu.dot_dimension_numbers<[1], [0], [0], [1], [0, 0, 1, 1], [], []>} : vector<8x32xf32>, vector<32x128xf32>, vector<8x128xf32> -> vector<8x128xf32>
    %58 = arith.addf %56, %57 : vector<8x128xf32>
    %59 = arith.negf %58 : vector<8x128xf32>
    %60 = math.exp %59 : vector<8x128xf32>
    %cst_24 = arith.constant 1.000000e+00 : f32
    %61 = vector.broadcast %cst_24 : f32 to vector<8x128xf32>
    %62 = arith.addf %61, %60 : vector<8x128xf32>
    %63 = arith.divf %61, %62 : vector<8x128xf32>
    %64 = vector.extract_strided_slice %63 {offsets = [0, 0], sizes = [8, 32], strides = [1, 1]} : vector<8x128xf32> to vector<8x32xf32>
    %65 = vector.extract_strided_slice %63 {offsets = [0, 32], sizes = [8, 32], strides = [1, 1]} : vector<8x128xf32> to vector<8x32xf32>
    %66 = vector.extract_strided_slice %63 {offsets = [0, 64], sizes = [8, 32], strides = [1, 1]} : vector<8x128xf32> to vector<8x32xf32>
    %cst_25 = arith.constant 2.000000e+00 : f32
    %67 = vector.broadcast %cst_25 : f32 to vector<8x32xf32>
    %68 = arith.mulf %67, %66 : vector<8x32xf32>
    %cst_26 = arith.constant 1.000000e+00 : f32
    %69 = vector.broadcast %cst_26 : f32 to vector<8x32xf32>
    %70 = arith.subf %68, %69 : vector<8x32xf32>
    %71 = vector.extract_strided_slice %63 {offsets = [0, 96], sizes = [8, 32], strides = [1, 1]} : vector<8x128xf32> to vector<8x32xf32>
    %72 = arith.mulf %65, %31 : vector<8x32xf32>
    %73 = arith.mulf %64, %70 : vector<8x32xf32>
    %74 = arith.addf %72, %73 : vector<8x32xf32>
    %75 = math.tanh %74 : vector<8x32xf32>
    %76 = arith.mulf %71, %75 : vector<8x32xf32>
    %cst_27 = arith.constant dense<0.000000e+00> : vector<8x128xf32>
    %77 = tpu.matmul %55, %8, %cst_27 {dimension_numbers = #tpu.dot_dimension_numbers<[1], [0], [0], [1], [0, 0, 1, 1], [], []>} : vector<8x32xf32>, vector<32x128xf32>, vector<8x128xf32> -> vector<8x128xf32>
    %cst_28 = arith.constant dense<0.000000e+00> : vector<8x128xf32>
    %78 = tpu.matmul %76, %7, %cst_28 {dimension_numbers = #tpu.dot_dimension_numbers<[1], [0], [0], [1], [0, 0, 1, 1], [], []>} : vector<8x32xf32>, vector<32x128xf32>, vector<8x128xf32> -> vector<8x128xf32>
    %79 = arith.addf %77, %78 : vector<8x128xf32>
    %80 = arith.addf %79, %11 : vector<8x128xf32>
    %81 = arith.negf %80 : vector<8x128xf32>
    %82 = math.exp %81 : vector<8x128xf32>
    %cst_29 = arith.constant 1.000000e+00 : f32
    %83 = vector.broadcast %cst_29 : f32 to vector<8x128xf32>
    %84 = arith.addf %83, %82 : vector<8x128xf32>
    %85 = arith.divf %83, %84 : vector<8x128xf32>
    %86 = vector.extract_strided_slice %85 {offsets = [0, 0], sizes = [8, 32], strides = [1, 1]} : vector<8x128xf32> to vector<8x32xf32>
    %87 = vector.extract_strided_slice %85 {offsets = [0, 32], sizes = [8, 32], strides = [1, 1]} : vector<8x128xf32> to vector<8x32xf32>
    %88 = vector.extract_strided_slice %85 {offsets = [0, 64], sizes = [8, 32], strides = [1, 1]} : vector<8x128xf32> to vector<8x32xf32>
    %cst_30 = arith.constant 2.000000e+00 : f32
    %89 = vector.broadcast %cst_30 : f32 to vector<8x32xf32>
    %90 = arith.mulf %89, %88 : vector<8x32xf32>
    %cst_31 = arith.constant 1.000000e+00 : f32
    %91 = vector.broadcast %cst_31 : f32 to vector<8x32xf32>
    %92 = arith.subf %90, %91 : vector<8x32xf32>
    %93 = vector.extract_strided_slice %85 {offsets = [0, 96], sizes = [8, 32], strides = [1, 1]} : vector<8x128xf32> to vector<8x32xf32>
    %94 = arith.mulf %87, %53 : vector<8x32xf32>
    %95 = arith.mulf %86, %92 : vector<8x32xf32>
    %96 = arith.addf %94, %95 : vector<8x32xf32>
    %97 = math.tanh %96 : vector<8x32xf32>
    %98 = arith.mulf %93, %97 : vector<8x32xf32>
    %99 = vector.extract_strided_slice %5 {offsets = [16, 0], sizes = [8, 128], strides = [1, 1]} : vector<64x128xf32> to vector<8x128xf32>
    %cst_32 = arith.constant dense<0.000000e+00> : vector<8x128xf32>
    %100 = tpu.matmul %76, %6, %cst_32 {dimension_numbers = #tpu.dot_dimension_numbers<[1], [0], [0], [1], [0, 0, 1, 1], [], []>} : vector<8x32xf32>, vector<32x128xf32>, vector<8x128xf32> -> vector<8x128xf32>
    %101 = arith.addf %99, %100 : vector<8x128xf32>
    %102 = arith.negf %101 : vector<8x128xf32>
    %103 = math.exp %102 : vector<8x128xf32>
    %cst_33 = arith.constant 1.000000e+00 : f32
    %104 = vector.broadcast %cst_33 : f32 to vector<8x128xf32>
    %105 = arith.addf %104, %103 : vector<8x128xf32>
    %106 = arith.divf %104, %105 : vector<8x128xf32>
    %107 = vector.extract_strided_slice %106 {offsets = [0, 0], sizes = [8, 32], strides = [1, 1]} : vector<8x128xf32> to vector<8x32xf32>
    %108 = vector.extract_strided_slice %106 {offsets = [0, 32], sizes = [8, 32], strides = [1, 1]} : vector<8x128xf32> to vector<8x32xf32>
    %109 = vector.extract_strided_slice %106 {offsets = [0, 64], sizes = [8, 32], strides = [1, 1]} : vector<8x128xf32> to vector<8x32xf32>
    %cst_34 = arith.constant 2.000000e+00 : f32
    %110 = vector.broadcast %cst_34 : f32 to vector<8x32xf32>
    %111 = arith.mulf %110, %109 : vector<8x32xf32>
    %cst_35 = arith.constant 1.000000e+00 : f32
    %112 = vector.broadcast %cst_35 : f32 to vector<8x32xf32>
    %113 = arith.subf %111, %112 : vector<8x32xf32>
    %114 = vector.extract_strided_slice %106 {offsets = [0, 96], sizes = [8, 32], strides = [1, 1]} : vector<8x128xf32> to vector<8x32xf32>
    %115 = arith.mulf %108, %74 : vector<8x32xf32>
    %116 = arith.mulf %107, %113 : vector<8x32xf32>
    %117 = arith.addf %115, %116 : vector<8x32xf32>
    %118 = math.tanh %117 : vector<8x32xf32>
    %119 = arith.mulf %114, %118 : vector<8x32xf32>
    %cst_36 = arith.constant dense<0.000000e+00> : vector<8x128xf32>
    %120 = tpu.matmul %98, %8, %cst_36 {dimension_numbers = #tpu.dot_dimension_numbers<[1], [0], [0], [1], [0, 0, 1, 1], [], []>} : vector<8x32xf32>, vector<32x128xf32>, vector<8x128xf32> -> vector<8x128xf32>
    %cst_37 = arith.constant dense<0.000000e+00> : vector<8x128xf32>
    %121 = tpu.matmul %119, %7, %cst_37 {dimension_numbers = #tpu.dot_dimension_numbers<[1], [0], [0], [1], [0, 0, 1, 1], [], []>} : vector<8x32xf32>, vector<32x128xf32>, vector<8x128xf32> -> vector<8x128xf32>
    %122 = arith.addf %120, %121 : vector<8x128xf32>
    %123 = arith.addf %122, %11 : vector<8x128xf32>
    %124 = arith.negf %123 : vector<8x128xf32>
    %125 = math.exp %124 : vector<8x128xf32>
    %cst_38 = arith.constant 1.000000e+00 : f32
    %126 = vector.broadcast %cst_38 : f32 to vector<8x128xf32>
    %127 = arith.addf %126, %125 : vector<8x128xf32>
    %128 = arith.divf %126, %127 : vector<8x128xf32>
    %129 = vector.extract_strided_slice %128 {offsets = [0, 0], sizes = [8, 32], strides = [1, 1]} : vector<8x128xf32> to vector<8x32xf32>
    %130 = vector.extract_strided_slice %128 {offsets = [0, 32], sizes = [8, 32], strides = [1, 1]} : vector<8x128xf32> to vector<8x32xf32>
    %131 = vector.extract_strided_slice %128 {offsets = [0, 64], sizes = [8, 32], strides = [1, 1]} : vector<8x128xf32> to vector<8x32xf32>
    %cst_39 = arith.constant 2.000000e+00 : f32
    %132 = vector.broadcast %cst_39 : f32 to vector<8x32xf32>
    %133 = arith.mulf %132, %131 : vector<8x32xf32>
    %cst_40 = arith.constant 1.000000e+00 : f32
    %134 = vector.broadcast %cst_40 : f32 to vector<8x32xf32>
    %135 = arith.subf %133, %134 : vector<8x32xf32>
    %136 = vector.extract_strided_slice %128 {offsets = [0, 96], sizes = [8, 32], strides = [1, 1]} : vector<8x128xf32> to vector<8x32xf32>
    %137 = arith.mulf %130, %96 : vector<8x32xf32>
    %138 = arith.mulf %129, %135 : vector<8x32xf32>
    %139 = arith.addf %137, %138 : vector<8x32xf32>
    %140 = math.tanh %139 : vector<8x32xf32>
    %141 = arith.mulf %136, %140 : vector<8x32xf32>
    %142 = vector.extract_strided_slice %5 {offsets = [24, 0], sizes = [8, 128], strides = [1, 1]} : vector<64x128xf32> to vector<8x128xf32>
    %cst_41 = arith.constant dense<0.000000e+00> : vector<8x128xf32>
    %143 = tpu.matmul %119, %6, %cst_41 {dimension_numbers = #tpu.dot_dimension_numbers<[1], [0], [0], [1], [0, 0, 1, 1], [], []>} : vector<8x32xf32>, vector<32x128xf32>, vector<8x128xf32> -> vector<8x128xf32>
    %144 = arith.addf %142, %143 : vector<8x128xf32>
    %145 = arith.negf %144 : vector<8x128xf32>
    %146 = math.exp %145 : vector<8x128xf32>
    %cst_42 = arith.constant 1.000000e+00 : f32
    %147 = vector.broadcast %cst_42 : f32 to vector<8x128xf32>
    %148 = arith.addf %147, %146 : vector<8x128xf32>
    %149 = arith.divf %147, %148 : vector<8x128xf32>
    %150 = vector.extract_strided_slice %149 {offsets = [0, 0], sizes = [8, 32], strides = [1, 1]} : vector<8x128xf32> to vector<8x32xf32>
    %151 = vector.extract_strided_slice %149 {offsets = [0, 32], sizes = [8, 32], strides = [1, 1]} : vector<8x128xf32> to vector<8x32xf32>
    %152 = vector.extract_strided_slice %149 {offsets = [0, 64], sizes = [8, 32], strides = [1, 1]} : vector<8x128xf32> to vector<8x32xf32>
    %cst_43 = arith.constant 2.000000e+00 : f32
    %153 = vector.broadcast %cst_43 : f32 to vector<8x32xf32>
    %154 = arith.mulf %153, %152 : vector<8x32xf32>
    %cst_44 = arith.constant 1.000000e+00 : f32
    %155 = vector.broadcast %cst_44 : f32 to vector<8x32xf32>
    %156 = arith.subf %154, %155 : vector<8x32xf32>
    %157 = vector.extract_strided_slice %149 {offsets = [0, 96], sizes = [8, 32], strides = [1, 1]} : vector<8x128xf32> to vector<8x32xf32>
    %158 = arith.mulf %151, %117 : vector<8x32xf32>
    %159 = arith.mulf %150, %156 : vector<8x32xf32>
    %160 = arith.addf %158, %159 : vector<8x32xf32>
    %161 = math.tanh %160 : vector<8x32xf32>
    %162 = arith.mulf %157, %161 : vector<8x32xf32>
    %cst_45 = arith.constant dense<0.000000e+00> : vector<8x128xf32>
    %163 = tpu.matmul %141, %8, %cst_45 {dimension_numbers = #tpu.dot_dimension_numbers<[1], [0], [0], [1], [0, 0, 1, 1], [], []>} : vector<8x32xf32>, vector<32x128xf32>, vector<8x128xf32> -> vector<8x128xf32>
    %cst_46 = arith.constant dense<0.000000e+00> : vector<8x128xf32>
    %164 = tpu.matmul %162, %7, %cst_46 {dimension_numbers = #tpu.dot_dimension_numbers<[1], [0], [0], [1], [0, 0, 1, 1], [], []>} : vector<8x32xf32>, vector<32x128xf32>, vector<8x128xf32> -> vector<8x128xf32>
    %165 = arith.addf %163, %164 : vector<8x128xf32>
    %166 = arith.addf %165, %11 : vector<8x128xf32>
    %167 = arith.negf %166 : vector<8x128xf32>
    %168 = math.exp %167 : vector<8x128xf32>
    %cst_47 = arith.constant 1.000000e+00 : f32
    %169 = vector.broadcast %cst_47 : f32 to vector<8x128xf32>
    %170 = arith.addf %169, %168 : vector<8x128xf32>
    %171 = arith.divf %169, %170 : vector<8x128xf32>
    %172 = vector.extract_strided_slice %171 {offsets = [0, 0], sizes = [8, 32], strides = [1, 1]} : vector<8x128xf32> to vector<8x32xf32>
    %173 = vector.extract_strided_slice %171 {offsets = [0, 32], sizes = [8, 32], strides = [1, 1]} : vector<8x128xf32> to vector<8x32xf32>
    %174 = vector.extract_strided_slice %171 {offsets = [0, 64], sizes = [8, 32], strides = [1, 1]} : vector<8x128xf32> to vector<8x32xf32>
    %cst_48 = arith.constant 2.000000e+00 : f32
    %175 = vector.broadcast %cst_48 : f32 to vector<8x32xf32>
    %176 = arith.mulf %175, %174 : vector<8x32xf32>
    %cst_49 = arith.constant 1.000000e+00 : f32
    %177 = vector.broadcast %cst_49 : f32 to vector<8x32xf32>
    %178 = arith.subf %176, %177 : vector<8x32xf32>
    %179 = vector.extract_strided_slice %171 {offsets = [0, 96], sizes = [8, 32], strides = [1, 1]} : vector<8x128xf32> to vector<8x32xf32>
    %180 = arith.mulf %173, %139 : vector<8x32xf32>
    %181 = arith.mulf %172, %178 : vector<8x32xf32>
    %182 = arith.addf %180, %181 : vector<8x32xf32>
    %183 = math.tanh %182 : vector<8x32xf32>
    %184 = arith.mulf %179, %183 : vector<8x32xf32>
    %185 = vector.extract_strided_slice %5 {offsets = [32, 0], sizes = [8, 128], strides = [1, 1]} : vector<64x128xf32> to vector<8x128xf32>
    %cst_50 = arith.constant dense<0.000000e+00> : vector<8x128xf32>
    %186 = tpu.matmul %162, %6, %cst_50 {dimension_numbers = #tpu.dot_dimension_numbers<[1], [0], [0], [1], [0, 0, 1, 1], [], []>} : vector<8x32xf32>, vector<32x128xf32>, vector<8x128xf32> -> vector<8x128xf32>
    %187 = arith.addf %185, %186 : vector<8x128xf32>
    %188 = arith.negf %187 : vector<8x128xf32>
    %189 = math.exp %188 : vector<8x128xf32>
    %cst_51 = arith.constant 1.000000e+00 : f32
    %190 = vector.broadcast %cst_51 : f32 to vector<8x128xf32>
    %191 = arith.addf %190, %189 : vector<8x128xf32>
    %192 = arith.divf %190, %191 : vector<8x128xf32>
    %193 = vector.extract_strided_slice %192 {offsets = [0, 0], sizes = [8, 32], strides = [1, 1]} : vector<8x128xf32> to vector<8x32xf32>
    %194 = vector.extract_strided_slice %192 {offsets = [0, 32], sizes = [8, 32], strides = [1, 1]} : vector<8x128xf32> to vector<8x32xf32>
    %195 = vector.extract_strided_slice %192 {offsets = [0, 64], sizes = [8, 32], strides = [1, 1]} : vector<8x128xf32> to vector<8x32xf32>
    %cst_52 = arith.constant 2.000000e+00 : f32
    %196 = vector.broadcast %cst_52 : f32 to vector<8x32xf32>
    %197 = arith.mulf %196, %195 : vector<8x32xf32>
    %cst_53 = arith.constant 1.000000e+00 : f32
    %198 = vector.broadcast %cst_53 : f32 to vector<8x32xf32>
    %199 = arith.subf %197, %198 : vector<8x32xf32>
    %200 = vector.extract_strided_slice %192 {offsets = [0, 96], sizes = [8, 32], strides = [1, 1]} : vector<8x128xf32> to vector<8x32xf32>
    %201 = arith.mulf %194, %160 : vector<8x32xf32>
    %202 = arith.mulf %193, %199 : vector<8x32xf32>
    %203 = arith.addf %201, %202 : vector<8x32xf32>
    %204 = math.tanh %203 : vector<8x32xf32>
    %205 = arith.mulf %200, %204 : vector<8x32xf32>
    %cst_54 = arith.constant dense<0.000000e+00> : vector<8x128xf32>
    %206 = tpu.matmul %184, %8, %cst_54 {dimension_numbers = #tpu.dot_dimension_numbers<[1], [0], [0], [1], [0, 0, 1, 1], [], []>} : vector<8x32xf32>, vector<32x128xf32>, vector<8x128xf32> -> vector<8x128xf32>
    %cst_55 = arith.constant dense<0.000000e+00> : vector<8x128xf32>
    %207 = tpu.matmul %205, %7, %cst_55 {dimension_numbers = #tpu.dot_dimension_numbers<[1], [0], [0], [1], [0, 0, 1, 1], [], []>} : vector<8x32xf32>, vector<32x128xf32>, vector<8x128xf32> -> vector<8x128xf32>
    %208 = arith.addf %206, %207 : vector<8x128xf32>
    %209 = arith.addf %208, %11 : vector<8x128xf32>
    %210 = arith.negf %209 : vector<8x128xf32>
    %211 = math.exp %210 : vector<8x128xf32>
    %cst_56 = arith.constant 1.000000e+00 : f32
    %212 = vector.broadcast %cst_56 : f32 to vector<8x128xf32>
    %213 = arith.addf %212, %211 : vector<8x128xf32>
    %214 = arith.divf %212, %213 : vector<8x128xf32>
    %215 = vector.extract_strided_slice %214 {offsets = [0, 0], sizes = [8, 32], strides = [1, 1]} : vector<8x128xf32> to vector<8x32xf32>
    %216 = vector.extract_strided_slice %214 {offsets = [0, 32], sizes = [8, 32], strides = [1, 1]} : vector<8x128xf32> to vector<8x32xf32>
    %217 = vector.extract_strided_slice %214 {offsets = [0, 64], sizes = [8, 32], strides = [1, 1]} : vector<8x128xf32> to vector<8x32xf32>
    %cst_57 = arith.constant 2.000000e+00 : f32
    %218 = vector.broadcast %cst_57 : f32 to vector<8x32xf32>
    %219 = arith.mulf %218, %217 : vector<8x32xf32>
    %cst_58 = arith.constant 1.000000e+00 : f32
    %220 = vector.broadcast %cst_58 : f32 to vector<8x32xf32>
    %221 = arith.subf %219, %220 : vector<8x32xf32>
    %222 = vector.extract_strided_slice %214 {offsets = [0, 96], sizes = [8, 32], strides = [1, 1]} : vector<8x128xf32> to vector<8x32xf32>
    %223 = arith.mulf %216, %182 : vector<8x32xf32>
    %224 = arith.mulf %215, %221 : vector<8x32xf32>
    %225 = arith.addf %223, %224 : vector<8x32xf32>
    %226 = math.tanh %225 : vector<8x32xf32>
    %227 = arith.mulf %222, %226 : vector<8x32xf32>
    %228 = vector.extract_strided_slice %5 {offsets = [40, 0], sizes = [8, 128], strides = [1, 1]} : vector<64x128xf32> to vector<8x128xf32>
    %cst_59 = arith.constant dense<0.000000e+00> : vector<8x128xf32>
    %229 = tpu.matmul %205, %6, %cst_59 {dimension_numbers = #tpu.dot_dimension_numbers<[1], [0], [0], [1], [0, 0, 1, 1], [], []>} : vector<8x32xf32>, vector<32x128xf32>, vector<8x128xf32> -> vector<8x128xf32>
    %230 = arith.addf %228, %229 : vector<8x128xf32>
    %231 = arith.negf %230 : vector<8x128xf32>
    %232 = math.exp %231 : vector<8x128xf32>
    %cst_60 = arith.constant 1.000000e+00 : f32
    %233 = vector.broadcast %cst_60 : f32 to vector<8x128xf32>
    %234 = arith.addf %233, %232 : vector<8x128xf32>
    %235 = arith.divf %233, %234 : vector<8x128xf32>
    %236 = vector.extract_strided_slice %235 {offsets = [0, 0], sizes = [8, 32], strides = [1, 1]} : vector<8x128xf32> to vector<8x32xf32>
    %237 = vector.extract_strided_slice %235 {offsets = [0, 32], sizes = [8, 32], strides = [1, 1]} : vector<8x128xf32> to vector<8x32xf32>
    %238 = vector.extract_strided_slice %235 {offsets = [0, 64], sizes = [8, 32], strides = [1, 1]} : vector<8x128xf32> to vector<8x32xf32>
    %cst_61 = arith.constant 2.000000e+00 : f32
    %239 = vector.broadcast %cst_61 : f32 to vector<8x32xf32>
    %240 = arith.mulf %239, %238 : vector<8x32xf32>
    %cst_62 = arith.constant 1.000000e+00 : f32
    %241 = vector.broadcast %cst_62 : f32 to vector<8x32xf32>
    %242 = arith.subf %240, %241 : vector<8x32xf32>
    %243 = vector.extract_strided_slice %235 {offsets = [0, 96], sizes = [8, 32], strides = [1, 1]} : vector<8x128xf32> to vector<8x32xf32>
    %244 = arith.mulf %237, %203 : vector<8x32xf32>
    %245 = arith.mulf %236, %242 : vector<8x32xf32>
    %246 = arith.addf %244, %245 : vector<8x32xf32>
    %247 = math.tanh %246 : vector<8x32xf32>
    %248 = arith.mulf %243, %247 : vector<8x32xf32>
    %cst_63 = arith.constant dense<0.000000e+00> : vector<8x128xf32>
    %249 = tpu.matmul %227, %8, %cst_63 {dimension_numbers = #tpu.dot_dimension_numbers<[1], [0], [0], [1], [0, 0, 1, 1], [], []>} : vector<8x32xf32>, vector<32x128xf32>, vector<8x128xf32> -> vector<8x128xf32>
    %cst_64 = arith.constant dense<0.000000e+00> : vector<8x128xf32>
    %250 = tpu.matmul %248, %7, %cst_64 {dimension_numbers = #tpu.dot_dimension_numbers<[1], [0], [0], [1], [0, 0, 1, 1], [], []>} : vector<8x32xf32>, vector<32x128xf32>, vector<8x128xf32> -> vector<8x128xf32>
    %251 = arith.addf %249, %250 : vector<8x128xf32>
    %252 = arith.addf %251, %11 : vector<8x128xf32>
    %253 = arith.negf %252 : vector<8x128xf32>
    %254 = math.exp %253 : vector<8x128xf32>
    %cst_65 = arith.constant 1.000000e+00 : f32
    %255 = vector.broadcast %cst_65 : f32 to vector<8x128xf32>
    %256 = arith.addf %255, %254 : vector<8x128xf32>
    %257 = arith.divf %255, %256 : vector<8x128xf32>
    %258 = vector.extract_strided_slice %257 {offsets = [0, 0], sizes = [8, 32], strides = [1, 1]} : vector<8x128xf32> to vector<8x32xf32>
    %259 = vector.extract_strided_slice %257 {offsets = [0, 32], sizes = [8, 32], strides = [1, 1]} : vector<8x128xf32> to vector<8x32xf32>
    %260 = vector.extract_strided_slice %257 {offsets = [0, 64], sizes = [8, 32], strides = [1, 1]} : vector<8x128xf32> to vector<8x32xf32>
    %cst_66 = arith.constant 2.000000e+00 : f32
    %261 = vector.broadcast %cst_66 : f32 to vector<8x32xf32>
    %262 = arith.mulf %261, %260 : vector<8x32xf32>
    %cst_67 = arith.constant 1.000000e+00 : f32
    %263 = vector.broadcast %cst_67 : f32 to vector<8x32xf32>
    %264 = arith.subf %262, %263 : vector<8x32xf32>
    %265 = vector.extract_strided_slice %257 {offsets = [0, 96], sizes = [8, 32], strides = [1, 1]} : vector<8x128xf32> to vector<8x32xf32>
    %266 = arith.mulf %259, %225 : vector<8x32xf32>
    %267 = arith.mulf %258, %264 : vector<8x32xf32>
    %268 = arith.addf %266, %267 : vector<8x32xf32>
    %269 = math.tanh %268 : vector<8x32xf32>
    %270 = arith.mulf %265, %269 : vector<8x32xf32>
    %271 = vector.extract_strided_slice %5 {offsets = [48, 0], sizes = [8, 128], strides = [1, 1]} : vector<64x128xf32> to vector<8x128xf32>
    %cst_68 = arith.constant dense<0.000000e+00> : vector<8x128xf32>
    %272 = tpu.matmul %248, %6, %cst_68 {dimension_numbers = #tpu.dot_dimension_numbers<[1], [0], [0], [1], [0, 0, 1, 1], [], []>} : vector<8x32xf32>, vector<32x128xf32>, vector<8x128xf32> -> vector<8x128xf32>
    %273 = arith.addf %271, %272 : vector<8x128xf32>
    %274 = arith.negf %273 : vector<8x128xf32>
    %275 = math.exp %274 : vector<8x128xf32>
    %cst_69 = arith.constant 1.000000e+00 : f32
    %276 = vector.broadcast %cst_69 : f32 to vector<8x128xf32>
    %277 = arith.addf %276, %275 : vector<8x128xf32>
    %278 = arith.divf %276, %277 : vector<8x128xf32>
    %279 = vector.extract_strided_slice %278 {offsets = [0, 0], sizes = [8, 32], strides = [1, 1]} : vector<8x128xf32> to vector<8x32xf32>
    %280 = vector.extract_strided_slice %278 {offsets = [0, 32], sizes = [8, 32], strides = [1, 1]} : vector<8x128xf32> to vector<8x32xf32>
    %281 = vector.extract_strided_slice %278 {offsets = [0, 64], sizes = [8, 32], strides = [1, 1]} : vector<8x128xf32> to vector<8x32xf32>
    %cst_70 = arith.constant 2.000000e+00 : f32
    %282 = vector.broadcast %cst_70 : f32 to vector<8x32xf32>
    %283 = arith.mulf %282, %281 : vector<8x32xf32>
    %cst_71 = arith.constant 1.000000e+00 : f32
    %284 = vector.broadcast %cst_71 : f32 to vector<8x32xf32>
    %285 = arith.subf %283, %284 : vector<8x32xf32>
    %286 = vector.extract_strided_slice %278 {offsets = [0, 96], sizes = [8, 32], strides = [1, 1]} : vector<8x128xf32> to vector<8x32xf32>
    %287 = arith.mulf %280, %246 : vector<8x32xf32>
    %288 = arith.mulf %279, %285 : vector<8x32xf32>
    %289 = arith.addf %287, %288 : vector<8x32xf32>
    %290 = math.tanh %289 : vector<8x32xf32>
    %291 = arith.mulf %286, %290 : vector<8x32xf32>
    %cst_72 = arith.constant dense<0.000000e+00> : vector<8x128xf32>
    %292 = tpu.matmul %270, %8, %cst_72 {dimension_numbers = #tpu.dot_dimension_numbers<[1], [0], [0], [1], [0, 0, 1, 1], [], []>} : vector<8x32xf32>, vector<32x128xf32>, vector<8x128xf32> -> vector<8x128xf32>
    %cst_73 = arith.constant dense<0.000000e+00> : vector<8x128xf32>
    %293 = tpu.matmul %291, %7, %cst_73 {dimension_numbers = #tpu.dot_dimension_numbers<[1], [0], [0], [1], [0, 0, 1, 1], [], []>} : vector<8x32xf32>, vector<32x128xf32>, vector<8x128xf32> -> vector<8x128xf32>
    %294 = arith.addf %292, %293 : vector<8x128xf32>
    %295 = arith.addf %294, %11 : vector<8x128xf32>
    %296 = arith.negf %295 : vector<8x128xf32>
    %297 = math.exp %296 : vector<8x128xf32>
    %cst_74 = arith.constant 1.000000e+00 : f32
    %298 = vector.broadcast %cst_74 : f32 to vector<8x128xf32>
    %299 = arith.addf %298, %297 : vector<8x128xf32>
    %300 = arith.divf %298, %299 : vector<8x128xf32>
    %301 = vector.extract_strided_slice %300 {offsets = [0, 0], sizes = [8, 32], strides = [1, 1]} : vector<8x128xf32> to vector<8x32xf32>
    %302 = vector.extract_strided_slice %300 {offsets = [0, 32], sizes = [8, 32], strides = [1, 1]} : vector<8x128xf32> to vector<8x32xf32>
    %303 = vector.extract_strided_slice %300 {offsets = [0, 64], sizes = [8, 32], strides = [1, 1]} : vector<8x128xf32> to vector<8x32xf32>
    %cst_75 = arith.constant 2.000000e+00 : f32
    %304 = vector.broadcast %cst_75 : f32 to vector<8x32xf32>
    %305 = arith.mulf %304, %303 : vector<8x32xf32>
    %cst_76 = arith.constant 1.000000e+00 : f32
    %306 = vector.broadcast %cst_76 : f32 to vector<8x32xf32>
    %307 = arith.subf %305, %306 : vector<8x32xf32>
    %308 = vector.extract_strided_slice %300 {offsets = [0, 96], sizes = [8, 32], strides = [1, 1]} : vector<8x128xf32> to vector<8x32xf32>
    %309 = arith.mulf %302, %268 : vector<8x32xf32>
    %310 = arith.mulf %301, %307 : vector<8x32xf32>
    %311 = arith.addf %309, %310 : vector<8x32xf32>
    %312 = math.tanh %311 : vector<8x32xf32>
    %313 = arith.mulf %308, %312 : vector<8x32xf32>
    %314 = vector.extract_strided_slice %5 {offsets = [56, 0], sizes = [8, 128], strides = [1, 1]} : vector<64x128xf32> to vector<8x128xf32>
    %cst_77 = arith.constant dense<0.000000e+00> : vector<8x128xf32>
    %315 = tpu.matmul %291, %6, %cst_77 {dimension_numbers = #tpu.dot_dimension_numbers<[1], [0], [0], [1], [0, 0, 1, 1], [], []>} : vector<8x32xf32>, vector<32x128xf32>, vector<8x128xf32> -> vector<8x128xf32>
    %316 = arith.addf %314, %315 : vector<8x128xf32>
    %317 = arith.negf %316 : vector<8x128xf32>
    %318 = math.exp %317 : vector<8x128xf32>
    %cst_78 = arith.constant 1.000000e+00 : f32
    %319 = vector.broadcast %cst_78 : f32 to vector<8x128xf32>
    %320 = arith.addf %319, %318 : vector<8x128xf32>
    %321 = arith.divf %319, %320 : vector<8x128xf32>
    %322 = vector.extract_strided_slice %321 {offsets = [0, 0], sizes = [8, 32], strides = [1, 1]} : vector<8x128xf32> to vector<8x32xf32>
    %323 = vector.extract_strided_slice %321 {offsets = [0, 32], sizes = [8, 32], strides = [1, 1]} : vector<8x128xf32> to vector<8x32xf32>
    %324 = vector.extract_strided_slice %321 {offsets = [0, 64], sizes = [8, 32], strides = [1, 1]} : vector<8x128xf32> to vector<8x32xf32>
    %cst_79 = arith.constant 2.000000e+00 : f32
    %325 = vector.broadcast %cst_79 : f32 to vector<8x32xf32>
    %326 = arith.mulf %325, %324 : vector<8x32xf32>
    %cst_80 = arith.constant 1.000000e+00 : f32
    %327 = vector.broadcast %cst_80 : f32 to vector<8x32xf32>
    %328 = arith.subf %326, %327 : vector<8x32xf32>
    %329 = vector.extract_strided_slice %321 {offsets = [0, 96], sizes = [8, 32], strides = [1, 1]} : vector<8x128xf32> to vector<8x32xf32>
    %330 = arith.mulf %323, %289 : vector<8x32xf32>
    %331 = arith.mulf %322, %328 : vector<8x32xf32>
    %332 = arith.addf %330, %331 : vector<8x32xf32>
    %333 = math.tanh %332 : vector<8x32xf32>
    %334 = arith.mulf %329, %333 : vector<8x32xf32>
    %cst_81 = arith.constant dense<0.000000e+00> : vector<8x128xf32>
    %335 = tpu.matmul %313, %8, %cst_81 {dimension_numbers = #tpu.dot_dimension_numbers<[1], [0], [0], [1], [0, 0, 1, 1], [], []>} : vector<8x32xf32>, vector<32x128xf32>, vector<8x128xf32> -> vector<8x128xf32>
    %cst_82 = arith.constant dense<0.000000e+00> : vector<8x128xf32>
    %336 = tpu.matmul %334, %7, %cst_82 {dimension_numbers = #tpu.dot_dimension_numbers<[1], [0], [0], [1], [0, 0, 1, 1], [], []>} : vector<8x32xf32>, vector<32x128xf32>, vector<8x128xf32> -> vector<8x128xf32>
    %337 = arith.addf %335, %336 : vector<8x128xf32>
    %338 = arith.addf %337, %11 : vector<8x128xf32>
    %339 = arith.negf %338 : vector<8x128xf32>
    %340 = math.exp %339 : vector<8x128xf32>
    %cst_83 = arith.constant 1.000000e+00 : f32
    %341 = vector.broadcast %cst_83 : f32 to vector<8x128xf32>
    %342 = arith.addf %341, %340 : vector<8x128xf32>
    %343 = arith.divf %341, %342 : vector<8x128xf32>
    %344 = vector.extract_strided_slice %343 {offsets = [0, 0], sizes = [8, 32], strides = [1, 1]} : vector<8x128xf32> to vector<8x32xf32>
    %345 = vector.extract_strided_slice %343 {offsets = [0, 32], sizes = [8, 32], strides = [1, 1]} : vector<8x128xf32> to vector<8x32xf32>
    %346 = vector.extract_strided_slice %343 {offsets = [0, 64], sizes = [8, 32], strides = [1, 1]} : vector<8x128xf32> to vector<8x32xf32>
    %cst_84 = arith.constant 2.000000e+00 : f32
    %347 = vector.broadcast %cst_84 : f32 to vector<8x32xf32>
    %348 = arith.mulf %347, %346 : vector<8x32xf32>
    %cst_85 = arith.constant 1.000000e+00 : f32
    %349 = vector.broadcast %cst_85 : f32 to vector<8x32xf32>
    %350 = arith.subf %348, %349 : vector<8x32xf32>
    %351 = vector.extract_strided_slice %343 {offsets = [0, 96], sizes = [8, 32], strides = [1, 1]} : vector<8x128xf32> to vector<8x32xf32>
    %352 = arith.mulf %345, %311 : vector<8x32xf32>
    %353 = arith.mulf %344, %350 : vector<8x32xf32>
    %354 = arith.addf %352, %353 : vector<8x32xf32>
    %355 = math.tanh %354 : vector<8x32xf32>
    %356 = arith.mulf %351, %355 : vector<8x32xf32>
    %c0_86 = arith.constant 0 : index
    %c0_87 = arith.constant 0 : index
    %357 = vector.load %arg7[%c0_86, %c0_87] : memref<32x4xf32, #tpu.memory_space<vmem>>, vector<32x4xf32>
    %cst_88 = arith.constant dense<0.000000e+00> : vector<8x4xf32>
    %358 = tpu.matmul %356, %357, %cst_88 {dimension_numbers = #tpu.dot_dimension_numbers<[1], [0], [0], [1], [0, 0, 1, 1], [], []>} : vector<8x32xf32>, vector<32x4xf32>, vector<8x4xf32> -> vector<8x4xf32>
    %c0_89 = arith.constant 0 : index
    %c0_90 = arith.constant 0 : index
    %359 = vector.load %arg8[%c0_89, %c0_90] : memref<1x4xf32, #tpu.memory_space<vmem>>, vector<1x4xf32>
    %360 = vector.broadcast %359 : vector<1x4xf32> to vector<8x4xf32>
    %361 = arith.addf %358, %360 : vector<8x4xf32>
    %c0_91 = arith.constant 0 : index
    %c0_92 = arith.constant 0 : index
    %362 = vector.load %arg9[%c0_91, %c0_92] : memref<8x4xf32, #tpu.memory_space<vmem>>, vector<8x4xf32>
    tpu.vector_store %arg9[%c0_91, %c0_92], %361 {strides = array<i32>} : memref<8x4xf32, #tpu.memory_space<vmem>>, vector<8x4xf32>,
    return
  }
}

</mosaic_0001>

<bundles_post_ra>
// kernel: forward.1
= control target key start
LH: loop header
LB: loop body
LE: loop exit
PB: predicated region body
PF: predicated region fallthrough
CT: control target
= control target key end

     0   :  { %14 = vsyncpa [#allocation3], 0  ;;  %s3111_s30 = smov [#allocation2]   ;;  %s3744_s0 = inlined_call_operand.vmem [shape: f32[64,4], index: 0, kind: input, shape index: {}]   ;;  %s3745_s1 = inlined_call_operand.vmem [shape: f32[4,128], index: 1, kind: input, shape index: {}]   ;;  %s3746_s2 = inlined_call_operand.vmem [shape: f32[1,128], index: 2, kind: input, shape index: {}]   ;;  %s3747_s3 = inlined_call_operand.hbm [shape: f32[32,128], index: 3, kind: input, shape index: {}]   ;;  %s3748_s4 = inlined_call_operand.vmem [shape: f32[32,128], index: 4, kind: input, shape index: {}]   ;;  %s3749_s5 = inlined_call_operand.vmem [shape: f32[32,128], index: 5, kind: input, shape index: {}]   ;;  %s3750_s6 = inlined_call_operand.vmem [shape: f32[1,128], index: 6, kind: input, shape index: {}]   ;;  %s3751_s7 = inlined_call_operand.vmem [shape: f32[32,4], index: 7, kind: input, shape index: {}]   ;;  %s3752_s8 = inlined_call_operand.vmem [shape: f32[1,4], index: 8, kind: input, shape index: {}]   ;;  %s3753_s9 = inlined_call_operand.vmem [shape: f32[8,4], index: 9, kind: output, shape index: {}]  }
   0x1   :  { %s26_s10 = sshll.u32 %s3111_s30, 4  ;;  %s27_s10 = int_to_ptr.vmem [resolvable:$true] %s26_s10 }
   0x2   :  { %s3097_s11 = scalar_lea.vmem %s27_s10, 512  ;;  %p3102_p1 = scmp.lt.s32.totalorder %s27_s10, %s27_s10 }
   0x3   :  { %p3098_p0 = scmp.ne.s32.totalorder %s27_s10, %s3097_s11  ;;  %p3103_p2 = scmp.lt.s32.totalorder %s3097_s11, %s3097_s11 }
   0x5   :  { %p3104_p3 = por %p3103_p2, %p3102_p1 }
   0x7   :  { %p3105_p4 = pnand %p3104_p3, %p3098_p0 }
   0x9   :  { %3108 = shalt.err (!%p3105_p4)
}
   0xa   :  { %s3112_s12 = smov 128   ;;  %s3113_s13 = smov 8  }
   0xb   :  { %32 = dma.hbm_to_vmem [thread:$0]  %s3747_s3, 512, %s27_s10, [#allocation3], %s3112_s12, %s3112_s12, %s3113_s13  }
   0xc   :  { %3109 = dma.done.wait [#allocation3], 512  }
   0xd   :  { %3110 = vsyncadd [#allocation3], 4294966784  ;;  %v3114_v0 = vmov 0.0   ;;  %vm3115_vm0 = vmmov 0   ;;  %vm87_vm1 = vcmask 1043456   ;;  %vm62_vm2 = vcmask 31744  }
   0xe   :  { %2697 = vmatprep.subr.mxu1 %v3114_v0  ;;  %2705 = vmatprep.mubr.msk.f32.mxu1 %vm3115_vm0, %v3114_v0  ;;  %v54_v1 = vld [vmem:[%s3745_s1] sm:$0xf]  ;;  %v3177_v2 = vld [vmem:[#allocation2 + $0x18] sm:$0xff]  ;;  %v47_v4 = vld [vmem:[%s3744_s0 + $0x8] sm:$0xff]  ;;  %s3116_s22 = smov 64   ;;  %s3117_s23 = smov 32  }
   0xf   :  { %v46_v3 = vld [vmem:[%s3744_s0] sm:$0xff]  ;;  %2683 = vmatprep.subr.msk.mxu0 %vm87_vm1, %v54_v1  ;;  %2698 = vmatpush3.msra.mxu1 %v3177_v2  ;;  %v3186_v5 = vld [vmem:[#allocation2 + $0x10] sm:$0xff]  ;;  %v3191_v6 = vld [vmem:[#allocation2 + $0x8] sm:$0xff]  ;;  %vm215_vm3 = vcmask 261120  }
  0x10   :  { %2684 = vmatpush3.msk.msra.mxu0 %vm87_vm1, %v54_v1  ;;  %2685 = vmatprep.mubr.msk.f32.mxu0 %vm62_vm2, %v46_v3  ;;  %v3196_v7 = vld [vmem:[#allocation2] sm:$0xff]  ;;  %v48_v26 = vld [vmem:[%s3744_s0 + $0x10] sm:$0xff]  ;;  %v49_v27 = vld [vmem:[%s3744_s0 + $0x18] sm:$0xff] }
  0x11   :  { %2699 = vmatprep.subr.mxu1 %v3114_v0  ;;  %2686 = vmatmul.mubr.msk.f32.vlgmr.msra.gmra.mxu0 %vm62_vm2, %v47_v4  ;;  %v3210_v9 = vld [vmem:[%s3746_s2] ss:$0 sm:$0xff]  ;;  %v3236_v29 = vld [vmem:[%s3748_s4 + $0x18] sm:$0xff]  ;;  %v3248_v31 = vld [vmem:[%s3748_s4 + $0x10] sm:$0xff] }
  0x12   :  { %2700 = vmatpush3.msra.mxu1 %v3186_v5  ;;  %2719 = vmatprep.subr.mxu0 %v3114_v0  ;;  %v50_v28 = vld [vmem:[%s3744_s0 + $0x20] sm:$0xff]  ;;  %v3241_v30 = vld [vmem:[%s3749_s5 + $0x18] sm:$0xff]  ;;  %v51_v32 = vld [vmem:[%s3744_s0 + $0x28] sm:$0xff] }
  0x13   :  { %2701 = vmatprep.subr.mxu1 %v3114_v0  ;;  %2688 = vmatprep.mubr.msk.f32.mxu0 %vm62_vm2, %v48_v26  ;;  %v3258_v33 = vld [vmem:[%s3748_s4 + $0x8] sm:$0xff]  ;;  %v52_v34 = vld [vmem:[%s3744_s0 + $0x30] sm:$0xff]  ;;  %v3282_v37 = vld [vmem:[%s3748_s4] sm:$0xff] }
  0x14   :  { %2702 = vmatpush3.msra.mxu1 %v3191_v6  ;;  %2720 = vmatpush3.msra.mxu0 %v3241_v30  ;;  %v3268_v35 = vld [vmem:[%s3749_s5 + $0x10] sm:$0xff]  ;;  %v3277_v36 = vld [vmem:[%s3749_s5 + $0x8] sm:$0xff]  ;;  %v53_v38 = vld [vmem:[%s3744_s0 + $0x38] sm:$0xff] }
  0x15   :  { %2703 = vmatprep.subr.mxu1 %v3114_v0  ;;  %2689 = vmatmul.mubr.msk.f32.gmra.mxu0 %vm62_vm2, %v49_v27  ;;  %v3294_v39 = vld [vmem:[%s3749_s5] sm:$0xff] }
  0x16   :  { %2704 = vmatpush3.msra.mxu1 %v3196_v7  ;;  %2691 = vmatprep.mubr.msk.f32.mxu0 %vm62_vm2, %v50_v28  ;;  %v3356_v53 = vld [vmem:[%s3750_s6] ss:$0 sm:$0xff] }
  0x17   :  { %2706 = vmatmul.mubr.f32.vlgmr.msra.gmra.mxu1 %v3114_v0  ;;  %2708 = vmatprep.subr.mxu1 %v3114_v0 }
  0x18   :  { %2716 = vmatprep.mubr.msk.f32.mxu1 %vm3115_vm0, %v3114_v0  ;;  %2709 = vmatpush3.msra.mxu1 %v3236_v29 }
  0x19   :  { %2710 = vmatprep.subr.mxu1 %v3114_v0  ;;  %2721 = vmatprep.subr.mxu0 %v3114_v0 }
  0x1a   :  { %2711 = vmatpush3.msra.mxu1 %v3248_v31  ;;  %2692 = vmatmul.mubr.msk.f32.gmra.mxu0 %vm62_vm2, %v51_v32 }
  0x1b   :  { %2712 = vmatprep.subr.mxu1 %v3114_v0  ;;  %2694 = vmatprep.mubr.msk.f32.mxu0 %vm62_vm2, %v52_v34 }
  0x1c   :  { %2713 = vmatpush3.msra.mxu1 %v3258_v33  ;;  %2722 = vmatpush3.msra.mxu0 %v3268_v35 }
  0x1d   :  { %2723 = vmatprep.subr.mxu0 %v3114_v0  ;;  %2714 = vmatprep.subr.mxu1 %v3114_v0 }
  0x1e   :  { %2724 = vmatpush3.msra.mxu0 %v3277_v36  ;;  %2715 = vmatpush3.msra.mxu1 %v3282_v37 }
  0x1f   :  { %2695 = vmatmul.mubr.msk.f32.gmra.mxu0 %vm62_vm2, %v53_v38  ;;  %2725 = vmatprep.subr.mxu0 %v3114_v0 }
  0x20   :  { %2726 = vmatpush3.msra.mxu0 %v3294_v39  ;;  %2727 = vmatprep.mubr.msk.f32.mxu0 %vm3115_vm0, %v3114_v0 }
  0x21   :  { %2730 = vmatprep.subr.mxu1 %v3114_v0  ;;  %2741 = vmatprep.subr.mxu0 %v3114_v0 }
  0x23   :  { %2728 = vmatmul.mubr.f32.vlgmr.msra.gmra.mxu0 %v3114_v0 }
  0x24   :  { %2742 = vmatpush3.msra.mxu0 %v3236_v29  ;;  %2749 = vmatprep.mubr.msk.f32.mxu0 %vm3115_vm0, %v3114_v0 }
  0x25   :  { %2743 = vmatprep.subr.mxu0 %v3114_v0 }
  0x26   :  { %2744 = vmatpush3.msra.mxu0 %v3248_v31 }
  0x27   :  { %2745 = vmatprep.subr.mxu0 %v3114_v0 }
  0x28   :  { %2746 = vmatpush3.msra.mxu0 %v3258_v33 }
  0x29   :  { %2747 = vmatprep.subr.mxu0 %v3114_v0 }
  0x2a   :  { %2748 = vmatpush3.msra.mxu0 %v3282_v37 }
  0x2b   :  { %2763 = vmatprep.subr.mxu0 %v3114_v0 }
  0xd1   :  { %v3205_v8 = vpop.f32.mrf.mxu0 }
  0xd2   :  { %v163_v58 = vadd.f32 %v3205_v8, %v3210_v9 }
  0xd3   :  { %v157_v10 = vpop.f32.mrf.mxu0 }
  0xd4   :  { %v158_v11 = vadd.f32 %v3210_v9, %v157_v10 }
  0xd5   :  { %v3341_v44 = vpop.f32.mrf.mxu0 }
  0xd7   :  { %v285_v12 = vpop.f32.mrf.mxu1  ;;  %v3343_v45 = vpop.f32.mrf.mxu0 }
  0xd8   :  { %v289_v13 = vadd.f32 %v285_v12, %v158_v11 }
  0xd9   :  { %v2707_v14 = vpop.f32.mrf.mxu1 }
  0xda   :  { %v2493_v15 = vmul.f32 -1.442695, %v289_v13  ;;  %v3345_v46 = vpop.f32.mrf.mxu0 }
  0xdc   :  { %2979 = vpow2.f32 %v2493_v15  ;;  %v3347_v47 = vpop.f32.mrf.mxu0 }
  0xdf   :  { %v3349_v48 = vpop.f32.mrf.mxu0 }
  0xe1   :  { %v3351_v49 = vpop.f32.mrf.mxu0 }
  0xe3   :  { %v456_v50 = vpop.f32.mrf.mxu0 }
  0xe5   :  { %v2729_v51 = vpop.f32.mrf.mxu0 }
  0xe9   :  { %v2980_v16 = vpop.eup %2979 }
  0xea   :  { %v293_v17 = vadd.f32 1.0, %v2980_v16 }
  0xec   :  { %2981 = vrcp.f32 %v293_v17 }
  0xf9   :  { %v3213_v18 = vpop.eup %2981 }
  0xfa   :  { %v296_v19 = vmul.f32 2.0, %v3213_v18  ;;  %v298_v23 = vmul.f32 0.0, %v3213_v18 }
  0xfc   :  { %v2494_v20 = vadd.f32 -1.0, %v296_v19 }
  0xfe   :  { %300 = vrot.lane.b32.xlu0 %v2494_v20, %s3116_s22 }
 0x170   :  { %v301_v21 = vpop.permute.xlu0 %300 }
 0x171   :  { %v303_v22 = vmul.f32 %v3213_v18, %v301_v21 }
 0x173   :  { %305 = vrot.lane.b32.xlu0 %v303_v22, %s3117_s23 }
 0x1e5   :  { %v306_v24 = vpop.permute.xlu0 %305 }
 0x1e6   :  { %v3220_v25 = vadd.f32 %v306_v24, %v298_v23 }
 0x1e8   :  { %2983 = vtanh.f32 %v3220_v25 }
 0x1f5   :  { %v2984_v40 = vpop.eup %2983 }
 0x1f6   :  { %311 = vrot.lane.b32.xlu1 %v2984_v40, %s3116_s22 }
 0x268   :  { %v312_v41 = vpop.permute.xlu1 %311 }
 0x269   :  { %v314_v42 = vmul.f32 %v3213_v18, %v312_v41 }
 0x26b   :  { %316 = vrot.lane.b32.xlu1 %v314_v42, %s3117_s23 }
 0x2dd   :  { %v317_v43 = vpop.permute.xlu1 %316 }
 0x2de   :  { %2717 = vmatmul.mubr.msk.f32.vlgmr.msra.gmra.mxu1 %vm215_vm3, %v317_v43 }
 0x2df   :  { %2731 = vmatpush3.msra.mxu1 %v3177_v2  ;;  %2738 = vmatprep.mubr.msk.f32.mxu1 %vm3115_vm0, %v3114_v0 }
 0x2e0   :  { %2732 = vmatprep.subr.mxu1 %v3114_v0 }
 0x2e1   :  { %2733 = vmatpush3.msra.mxu1 %v3186_v5 }
 0x2e2   :  { %2734 = vmatprep.subr.mxu1 %v3114_v0 }
 0x2e3   :  { %2735 = vmatpush3.msra.mxu1 %v3191_v6 }
 0x2e4   :  { %2736 = vmatprep.subr.mxu1 %v3114_v0 }
 0x2e5   :  { %2737 = vmatpush3.msra.mxu1 %v3196_v7 }
 0x2e6   :  { %2739 = vmatmul.mubr.msk.f32.vlgmr.msra.gmra.mxu1 %vm215_vm3, %v317_v43  ;;  %2752 = vmatprep.subr.mxu1 %v3114_v0 }
 0x2e7   :  { %2753 = vmatpush3.msra.mxu1 %v3241_v30  ;;  %2760 = vmatprep.mubr.msk.f32.mxu1 %vm3115_vm0, %v3114_v0 }
 0x2e8   :  { %2754 = vmatprep.subr.mxu1 %v3114_v0 }
 0x2e9   :  { %2755 = vmatpush3.msra.mxu1 %v3268_v35 }
 0x2ea   :  { %2756 = vmatprep.subr.mxu1 %v3114_v0 }
 0x2eb   :  { %2757 = vmatpush3.msra.mxu1 %v3277_v36 }
 0x2ec   :  { %2758 = vmatprep.subr.mxu1 %v3114_v0 }
 0x2ed   :  { %2759 = vmatpush3.msra.mxu1 %v3294_v39 }
 0x2ee   :  { %2774 = vmatprep.subr.mxu1 %v3114_v0 }
 0x39e   :  { %v386_v52 = vpop.f32.mrf.mxu1 }
 0x39f   :  { %v457_v54 = vadd.f32 %v456_v50, %v386_v52 }
 0x3a0   :  { %v2718_v55 = vpop.f32.mrf.mxu1 }
 0x3a1   :  { %v460_v56 = vadd.f32 %v3356_v53, %v457_v54  ;;  %v168_v55 = vadd.f32 %v3210_v9, %v3343_v45 }
 0x3a3   :  { %v2496_v57 = vmul.f32 -1.442695, %v460_v56 }
 0x3a5   :  { %2985 = vpow2.f32 %v2496_v57 }
 0x3a6   :  { %v552_v59 = vpop.f32.mrf.mxu1 }
 0x3a7   :  { %v556_v60 = vadd.f32 %v552_v59, %v163_v58 }
 0x3a8   :  { %v2740_v61 = vpop.f32.mrf.mxu1 }
 0x3a9   :  { %v2499_v62 = vmul.f32 -1.442695, %v556_v60 }
 0x3ab   :  { %2987 = vpow2.f32 %v2499_v62 }
 0x3b2   :  { %v2986_v63 = vpop.eup %2985 }
 0x3b3   :  { %v464_v1 = vadd.f32 1.0, %v2986_v63 }
 0x3b5   :  { %2989 = vrcp.f32 %v464_v1 }
 0x3b8   :  { %v2988_v3 = vpop.eup %2987 }
 0x3b9   :  { %v560_v4 = vadd.f32 1.0, %v2988_v3 }
 0x3bb   :  { %2991 = vrcp.f32 %v560_v4 }
 0x3c2   :  { %v2990_v10 = vpop.eup %2989 }
 0x3c3   :  { %v467_v11 = vmul.f32 2.0, %v2990_v10  ;;  %v469_v19 = vmul.f32 0.0, %v2990_v10 }
 0x3c5   :  { %v2497_v12 = vadd.f32 -1.0, %v467_v11 }
 0x3c7   :  { %471 = vrot.lane.b32.xlu1 %v2497_v12, %s3116_s22 }
 0x3c8   :  { %v2992_v13 = vpop.eup %2991 }
 0x3c9   :  { %v563_v14 = vmul.f32 2.0, %v2992_v13  ;;  %v565_v22 = vmul.f32 %v2992_v13, %v3220_v25 }
 0x3cb   :  { %v2500_v8 = vadd.f32 -1.0, %v563_v14 }
 0x3cd   :  { %567 = vrot.lane.b32.xlu0 %v2500_v8, %s3116_s22 }
 0x439   :  { %v472_v15 = vpop.permute.xlu1 %471 }
 0x43a   :  { %v474_v16 = vmul.f32 %v2990_v10, %v472_v15 }
 0x43c   :  { %476 = vrot.lane.b32.xlu1 %v474_v16, %s3117_s23 }
 0x43f   :  { %v568_v17 = vpop.permute.xlu0 %567 }
 0x440   :  { %v570_v18 = vmul.f32 %v2992_v13, %v568_v17 }
 0x442   :  { %572 = vrot.lane.b32.xlu0 %v570_v18, %s3117_s23 }
 0x4ae   :  { %v477_v20 = vpop.permute.xlu1 %476 }
 0x4af   :  { %v3365_v21 = vadd.f32 %v477_v20, %v469_v19 }
 0x4b1   :  { %2993 = vtanh.f32 %v3365_v21 }
 0x4b4   :  { %v573_v23 = vpop.permute.xlu0 %572 }
 0x4b5   :  { %v3369_v24 = vadd.f32 %v573_v23, %v565_v22 }
 0x4b7   :  { %2995 = vtanh.f32 %v3369_v24 }
 0x4be   :  { %v2994_v26 = vpop.eup %2993 }
 0x4bf   :  { %482 = vrot.lane.b32.xlu1 %v2994_v26, %s3116_s22 }
 0x4c4   :  { %v2996_v27 = vpop.eup %2995 }
 0x4c5   :  { %578 = vrot.lane.b32.xlu0 %v2996_v27, %s3116_s22 }
 0x531   :  { %v483_v28 = vpop.permute.xlu1 %482 }
 0x532   :  { %v485_v32 = vmul.f32 %v2990_v10, %v483_v28 }
 0x534   :  { %658 = vrot.lane.b32.xlu1 %v485_v32, %s3117_s23 }
 0x537   :  { %v579_v34 = vpop.permute.xlu0 %578 }
 0x538   :  { %v581_v38 = vmul.f32 %v2992_v13, %v579_v34 }
 0x53a   :  { %583 = vrot.lane.b32.xlu0 %v581_v38, %s3117_s23 }
 0x5a6   :  { %v659_v25 = vpop.permute.xlu1 %658 }
 0x5a7   :  { %2761 = vmatmul.mubr.msk.f32.vlgmr.msra.gmra.mxu1 %vm215_vm3, %v659_v25 }
 0x5a8   :  { %2775 = vmatpush3.msra.mxu1 %v3236_v29  ;;  %2782 = vmatprep.mubr.msk.f32.mxu1 %vm3115_vm0, %v3114_v0 }
 0x5a9   :  { %2776 = vmatprep.subr.mxu1 %v3114_v0 }
 0x5aa   :  { %2777 = vmatpush3.msra.mxu1 %v3248_v31 }
 0x5ab   :  { %2778 = vmatprep.subr.mxu1 %v3114_v0 }
 0x5ac   :  { %v584_v40 = vpop.permute.xlu0 %583  ;;  %2779 = vmatpush3.msra.mxu1 %v3258_v33 }
 0x5ad   :  { %2750 = vmatmul.mubr.msk.f32.vlgmr.msra.gmra.mxu0 %vm215_vm3, %v584_v40  ;;  %2780 = vmatprep.subr.mxu1 %v3114_v0 }
 0x5ae   :  { %2764 = vmatpush3.msra.mxu0 %v3177_v2  ;;  %2771 = vmatprep.mubr.msk.f32.mxu0 %vm3115_vm0, %v3114_v0 }
 0x5af   :  { %2765 = vmatprep.subr.mxu0 %v3114_v0  ;;  %2781 = vmatpush3.msra.mxu1 %v3282_v37 }
 0x5b0   :  { %2766 = vmatpush3.msra.mxu0 %v3186_v5  ;;  %2796 = vmatprep.subr.mxu1 %v3114_v0 }
 0x5b1   :  { %2767 = vmatprep.subr.mxu0 %v3114_v0 }
 0x5b2   :  { %2768 = vmatpush3.msra.mxu0 %v3191_v6 }
 0x5b3   :  { %2769 = vmatprep.subr.mxu0 %v3114_v0 }
 0x5b4   :  { %2770 = vmatpush3.msra.mxu0 %v3196_v7 }
 0x5b5   :  { %2772 = vmatmul.mubr.msk.f32.vlgmr.msra.gmra.mxu0 %vm215_vm3, %v584_v40  ;;  %2785 = vmatprep.subr.mxu0 %v3114_v0 }
 0x5b6   :  { %2786 = vmatpush3.msra.mxu0 %v3241_v30  ;;  %2793 = vmatprep.mubr.msk.f32.mxu0 %vm3115_vm0, %v3114_v0 }
 0x5b7   :  { %2787 = vmatprep.subr.mxu0 %v3114_v0 }
 0x5b8   :  { %2788 = vmatpush3.msra.mxu0 %v3268_v35 }
 0x5b9   :  { %2789 = vmatprep.subr.mxu0 %v3114_v0 }
 0x5ba   :  { %2790 = vmatpush3.msra.mxu0 %v3277_v36 }
 0x5bb   :  { %2791 = vmatprep.subr.mxu0 %v3114_v0 }
 0x5bc   :  { %2792 = vmatpush3.msra.mxu0 %v3294_v39 }
 0x5bd   :  { %2807 = vmatprep.subr.mxu0 %v3114_v0 }
 0x667   :  { %v728_v41 = vpop.f32.mrf.mxu1 }
 0x669   :  { %v2762_v42 = vpop.f32.mrf.mxu1 }
 0x66d   :  { %v653_v43 = vpop.f32.mrf.mxu0 }
 0x66e   :  { %v729_v50 = vadd.f32 %v728_v41, %v653_v43 }
 0x66f   :  { %v2751_v51 = vpop.f32.mrf.mxu0 }
 0x670   :  { %v732_v52 = vadd.f32 %v3356_v53, %v729_v50  ;;  %v173_v50 = vadd.f32 %v3341_v44, %v3210_v9 }
 0x672   :  { %v2503_v54 = vmul.f32 -1.442695, %v732_v52 }
 0x674   :  { %2997 = vpow2.f32 %v2503_v54 }
 0x675   :  { %v824_v56 = vpop.f32.mrf.mxu0 }
 0x676   :  { %v828_v57 = vadd.f32 %v824_v56, %v168_v55 }
 0x677   :  { %v2773_v58 = vpop.f32.mrf.mxu0 }
 0x678   :  { %v2506_v59 = vmul.f32 -1.442695, %v828_v57 }
 0x67a   :  { %2999 = vpow2.f32 %v2506_v59 }
 0x681   :  { %v2998_v60 = vpop.eup %2997 }
 0x682   :  { %v736_v61 = vadd.f32 1.0, %v2998_v60 }
 0x684   :  { %3001 = vrcp.f32 %v736_v61 }
 0x687   :  { %v3000_v62 = vpop.eup %2999 }
 0x688   :  { %v832_v63 = vadd.f32 1.0, %v3000_v62 }
 0x68a   :  { %3003 = vrcp.f32 %v832_v63 }
 0x691   :  { %v3002_v1 = vpop.eup %3001 }
 0x692   :  { %v739_v3 = vmul.f32 2.0, %v3002_v1  ;;  %v741_v15 = vmul.f32 %v3002_v1, %v3365_v21 }
 0x694   :  { %v2504_v4 = vadd.f32 -1.0, %v739_v3 }
 0x696   :  { %743 = vrot.lane.b32.xlu1 %v2504_v4, %s3116_s22 }
 0x697   :  { %v3004_v10 = vpop.eup %3003 }
 0x698   :  { %v835_v11 = vmul.f32 2.0, %v3004_v10  ;;  %v837_v18 = vmul.f32 %v3004_v10, %v3369_v24 }
 0x69a   :  { %v2507_v45 = vadd.f32 -1.0, %v835_v11 }
 0x69c   :  { %839 = vrot.lane.b32.xlu0 %v2507_v45, %s3116_s22 }
 0x708   :  { %v744_v12 = vpop.permute.xlu1 %743 }
 0x709   :  { %v746_v13 = vmul.f32 %v3002_v1, %v744_v12 }
 0x70b   :  { %748 = vrot.lane.b32.xlu1 %v746_v13, %s3117_s23 }
 0x70e   :  { %v840_v14 = vpop.permute.xlu0 %839 }
 0x70f   :  { %v842_v8 = vmul.f32 %v3004_v10, %v840_v14 }
 0x711   :  { %844 = vrot.lane.b32.xlu0 %v842_v8, %s3117_s23 }
 0x77d   :  { %v749_v16 = vpop.permute.xlu1 %748 }
 0x77e   :  { %v3417_v17 = vadd.f32 %v749_v16, %v741_v15 }
 0x780   :  { %3005 = vtanh.f32 %v3417_v17 }
 0x783   :  { %v845_v19 = vpop.permute.xlu0 %844 }
 0x784   :  { %v3421_v20 = vadd.f32 %v845_v19, %v837_v18 }
 0x786   :  { %3007 = vtanh.f32 %v3421_v20 }
 0x78d   :  { %v3006_v22 = vpop.eup %3005 }
 0x78e   :  { %754 = vrot.lane.b32.xlu1 %v3006_v22, %s3116_s22 }
 0x793   :  { %v3008_v23 = vpop.eup %3007 }
 0x794   :  { %850 = vrot.lane.b32.xlu0 %v3008_v23, %s3116_s22 }
 0x800   :  { %v755_v26 = vpop.permute.xlu1 %754 }
 0x801   :  { %v757_v21 = vmul.f32 %v3002_v1, %v755_v26 }
 0x803   :  { %930 = vrot.lane.b32.xlu1 %v757_v21, %s3117_s23 }
 0x806   :  { %v851_v27 = vpop.permute.xlu0 %850 }
 0x807   :  { %v853_v28 = vmul.f32 %v3004_v10, %v851_v27 }
 0x809   :  { %855 = vrot.lane.b32.xlu0 %v853_v28, %s3117_s23 }
 0x875   :  { %v931_v24 = vpop.permute.xlu1 %930 }
 0x876   :  { %2794 = vmatmul.mubr.msk.f32.vlgmr.msra.gmra.mxu0 %vm215_vm3, %v931_v24 }
 0x877   :  { %2808 = vmatpush3.msra.mxu0 %v3236_v29  ;;  %2815 = vmatprep.mubr.msk.f32.mxu0 %vm3115_vm0, %v3114_v0 }
 0x878   :  { %2809 = vmatprep.subr.mxu0 %v3114_v0 }
 0x879   :  { %2810 = vmatpush3.msra.mxu0 %v3248_v31 }
 0x87a   :  { %2811 = vmatprep.subr.mxu0 %v3114_v0 }
 0x87b   :  { %v856_v32 = vpop.permute.xlu0 %855  ;;  %2812 = vmatpush3.msra.mxu0 %v3258_v33 }
 0x87c   :  { %2783 = vmatmul.mubr.msk.f32.vlgmr.msra.gmra.mxu1 %vm215_vm3, %v856_v32  ;;  %2813 = vmatprep.subr.mxu0 %v3114_v0 }
 0x87d   :  { %2797 = vmatpush3.msra.mxu1 %v3177_v2  ;;  %2804 = vmatprep.mubr.msk.f32.mxu1 %vm3115_vm0, %v3114_v0 }
 0x87e   :  { %2798 = vmatprep.subr.mxu1 %v3114_v0  ;;  %2814 = vmatpush3.msra.mxu0 %v3282_v37 }
 0x87f   :  { %2799 = vmatpush3.msra.mxu1 %v3186_v5  ;;  %2829 = vmatprep.subr.mxu0 %v3114_v0 }
 0x880   :  { %2800 = vmatprep.subr.mxu1 %v3114_v0 }
 0x881   :  { %2801 = vmatpush3.msra.mxu1 %v3191_v6 }
 0x882   :  { %2802 = vmatprep.subr.mxu1 %v3114_v0 }
 0x883   :  { %2803 = vmatpush3.msra.mxu1 %v3196_v7 }
 0x884   :  { %2805 = vmatmul.mubr.msk.f32.vlgmr.msra.gmra.mxu1 %vm215_vm3, %v856_v32  ;;  %2818 = vmatprep.subr.mxu1 %v3114_v0 }
 0x885   :  { %2819 = vmatpush3.msra.mxu1 %v3241_v30  ;;  %2826 = vmatprep.mubr.msk.f32.mxu1 %vm3115_vm0, %v3114_v0 }
 0x886   :  { %2820 = vmatprep.subr.mxu1 %v3114_v0 }
 0x887   :  { %2821 = vmatpush3.msra.mxu1 %v3268_v35 }
 0x888   :  { %2822 = vmatprep.subr.mxu1 %v3114_v0 }
 0x889   :  { %2823 = vmatpush3.msra.mxu1 %v3277_v36 }
 0x88a   :  { %2824 = vmatprep.subr.mxu1 %v3114_v0 }
 0x88b   :  { %2825 = vmatpush3.msra.mxu1 %v3294_v39 }
 0x88c   :  { %2840 = vmatprep.subr.mxu1 %v3114_v0 }
 0x936   :  { %v1000_v34 = vpop.f32.mrf.mxu0 }
 0x938   :  { %v2795_v38 = vpop.f32.mrf.mxu0 }
 0x93c   :  { %v925_v25 = vpop.f32.mrf.mxu1 }
 0x93d   :  { %v1001_v40 = vadd.f32 %v1000_v34, %v925_v25  ;;  %v178_v25 = vadd.f32 %v3210_v9, %v3347_v47 }
 0x93e   :  { %v2784_v41 = vpop.f32.mrf.mxu1 }
 0x93f   :  { %v1004_v42 = vadd.f32 %v3356_v53, %v1001_v40 }
 0x941   :  { %v2510_v43 = vmul.f32 -1.442695, %v1004_v42 }
 0x943   :  { %3009 = vpow2.f32 %v2510_v43 }
 0x944   :  { %v1096_v51 = vpop.f32.mrf.mxu1 }
 0x945   :  { %v1100_v52 = vadd.f32 %v1096_v51, %v173_v50 }
 0x946   :  { %v2806_v54 = vpop.f32.mrf.mxu1 }
 0x947   :  { %v2513_v55 = vmul.f32 -1.442695, %v1100_v52 }
 0x949   :  { %3011 = vpow2.f32 %v2513_v55 }
 0x950   :  { %v3010_v56 = vpop.eup %3009 }
 0x951   :  { %v1008_v57 = vadd.f32 1.0, %v3010_v56 }
 0x953   :  { %3013 = vrcp.f32 %v1008_v57 }
 0x956   :  { %v3012_v58 = vpop.eup %3011 }
 0x957   :  { %v1104_v59 = vadd.f32 1.0, %v3012_v58 }
 0x959   :  { %3015 = vrcp.f32 %v1104_v59 }
 0x960   :  { %v3014_v60 = vpop.eup %3013 }
 0x961   :  { %v1011_v61 = vmul.f32 2.0, %v3014_v60  ;;  %v1013_v45 = vmul.f32 %v3014_v60, %v3417_v17 }
 0x963   :  { %v2511_v62 = vadd.f32 -1.0, %v1011_v61 }
 0x965   :  { %1015 = vrot.lane.b32.xlu1 %v2511_v62, %s3116_s22 }
 0x966   :  { %v3016_v63 = vpop.eup %3015 }
 0x967   :  { %v1107_v1 = vmul.f32 2.0, %v3016_v63  ;;  %v1109_v14 = vmul.f32 %v3016_v63, %v3421_v20 }
 0x969   :  { %v2514_v44 = vadd.f32 -1.0, %v1107_v1 }
 0x96b   :  { %1111 = vrot.lane.b32.xlu0 %v2514_v44, %s3116_s22 }
 0x9d7   :  { %v1016_v3 = vpop.permute.xlu1 %1015 }
 0x9d8   :  { %v1018_v4 = vmul.f32 %v3014_v60, %v1016_v3 }
 0x9da   :  { %1020 = vrot.lane.b32.xlu1 %v1018_v4, %s3117_s23 }
 0x9dd   :  { %v1112_v10 = vpop.permute.xlu0 %1111 }
 0x9de   :  { %v1114_v11 = vmul.f32 %v3016_v63, %v1112_v10 }
 0x9e0   :  { %1116 = vrot.lane.b32.xlu0 %v1114_v11, %s3117_s23 }
 0xa4c   :  { %v1021_v12 = vpop.permute.xlu1 %1020 }
 0xa4d   :  { %v3469_v13 = vadd.f32 %v1021_v12, %v1013_v45 }
 0xa4f   :  { %3017 = vtanh.f32 %v3469_v13 }
 0xa52   :  { %v1117_v8 = vpop.permute.xlu0 %1116 }
 0xa53   :  { %v3473_v15 = vadd.f32 %v1117_v8, %v1109_v14 }
 0xa55   :  { %3019 = vtanh.f32 %v3473_v15 }
 0xa5c   :  { %v3018_v16 = vpop.eup %3017 }
 0xa5d   :  { %1026 = vrot.lane.b32.xlu1 %v3018_v16, %s3116_s22 }
 0xa62   :  { %v3020_v18 = vpop.eup %3019 }
 0xa63   :  { %1122 = vrot.lane.b32.xlu0 %v3020_v18, %s3116_s22 }
 0xacf   :  { %v1027_v19 = vpop.permute.xlu1 %1026 }
 0xad0   :  { %v1029_v17 = vmul.f32 %v3014_v60, %v1027_v19 }
 0xad2   :  { %1202 = vrot.lane.b32.xlu1 %v1029_v17, %s3117_s23 }
 0xad5   :  { %v1123_v22 = vpop.permute.xlu0 %1122 }
 0xad6   :  { %v1125_v23 = vmul.f32 %v3016_v63, %v1123_v22 }
 0xad8   :  { %1127 = vrot.lane.b32.xlu0 %v1125_v23, %s3117_s23  ;;  %v183_v23 = vadd.f32 %v3345_v46, %v3210_v9 }
 0xb44   :  { %v1203_v20 = vpop.permute.xlu1 %1202 }
 0xb45   :  { %2827 = vmatmul.mubr.msk.f32.vlgmr.msra.gmra.mxu1 %vm215_vm3, %v1203_v20 }
 0xb46   :  { %2841 = vmatpush3.msra.mxu1 %v3236_v29  ;;  %2848 = vmatprep.mubr.msk.f32.mxu1 %vm3115_vm0, %v3114_v0 }
 0xb47   :  { %2842 = vmatprep.subr.mxu1 %v3114_v0 }
 0xb48   :  { %2843 = vmatpush3.msra.mxu1 %v3248_v31 }
 0xb49   :  { %2844 = vmatprep.subr.mxu1 %v3114_v0 }
 0xb4a   :  { %v1128_v26 = vpop.permute.xlu0 %1127  ;;  %2845 = vmatpush3.msra.mxu1 %v3258_v33 }
 0xb4b   :  { %2816 = vmatmul.mubr.msk.f32.vlgmr.msra.gmra.mxu0 %vm215_vm3, %v1128_v26  ;;  %2846 = vmatprep.subr.mxu1 %v3114_v0 }
 0xb4c   :  { %2830 = vmatpush3.msra.mxu0 %v3177_v2  ;;  %2837 = vmatprep.mubr.msk.f32.mxu0 %vm3115_vm0, %v3114_v0 }
 0xb4d   :  { %2831 = vmatprep.subr.mxu0 %v3114_v0  ;;  %2847 = vmatpush3.msra.mxu1 %v3282_v37 }
 0xb4e   :  { %2832 = vmatpush3.msra.mxu0 %v3186_v5  ;;  %2862 = vmatprep.subr.mxu1 %v3114_v0 }
 0xb4f   :  { %2833 = vmatprep.subr.mxu0 %v3114_v0 }
 0xb50   :  { %2834 = vmatpush3.msra.mxu0 %v3191_v6 }
 0xb51   :  { %2835 = vmatprep.subr.mxu0 %v3114_v0 }
 0xb52   :  { %2836 = vmatpush3.msra.mxu0 %v3196_v7 }
 0xb53   :  { %2838 = vmatmul.mubr.msk.f32.vlgmr.msra.gmra.mxu0 %vm215_vm3, %v1128_v26  ;;  %2851 = vmatprep.subr.mxu0 %v3114_v0 }
 0xb54   :  { %2852 = vmatpush3.msra.mxu0 %v3241_v30  ;;  %2859 = vmatprep.mubr.msk.f32.mxu0 %vm3115_vm0, %v3114_v0 }
 0xb55   :  { %2853 = vmatprep.subr.mxu0 %v3114_v0 }
 0xb56   :  { %2854 = vmatpush3.msra.mxu0 %v3268_v35 }
 0xb57   :  { %2855 = vmatprep.subr.mxu0 %v3114_v0 }
 0xb58   :  { %2856 = vmatpush3.msra.mxu0 %v3277_v36 }
 0xb59   :  { %2857 = vmatprep.subr.mxu0 %v3114_v0 }
 0xb5a   :  { %2858 = vmatpush3.msra.mxu0 %v3294_v39 }
 0xb5b   :  { %2873 = vmatprep.subr.mxu0 %v3114_v0 }
 0xc05   :  { %v1272_v21 = vpop.f32.mrf.mxu1 }
 0xc07   :  { %v2828_v27 = vpop.f32.mrf.mxu1 }
 0xc0b   :  { %v1197_v28 = vpop.f32.mrf.mxu0 }
 0xc0c   :  { %v1273_v24 = vadd.f32 %v1272_v21, %v1197_v28 }
 0xc0d   :  { %v2817_v32 = vpop.f32.mrf.mxu0 }
 0xc0e   :  { %v1276_v34 = vadd.f32 %v3356_v53, %v1273_v24 }
 0xc10   :  { %v2517_v38 = vmul.f32 -1.442695, %v1276_v34 }
 0xc12   :  { %3021 = vpow2.f32 %v2517_v38 }
 0xc13   :  { %v1368_v40 = vpop.f32.mrf.mxu0 }
 0xc14   :  { %v1372_v41 = vadd.f32 %v1368_v40, %v178_v25 }
 0xc15   :  { %v2839_v42 = vpop.f32.mrf.mxu0 }
 0xc16   :  { %v2520_v43 = vmul.f32 -1.442695, %v1372_v41 }
 0xc18   :  { %3023 = vpow2.f32 %v2520_v43 }
 0xc1f   :  { %v3022_v50 = vpop.eup %3021 }
 0xc20   :  { %v1280_v51 = vadd.f32 1.0, %v3022_v50 }
 0xc22   :  { %3025 = vrcp.f32 %v1280_v51 }
 0xc25   :  { %v3024_v52 = vpop.eup %3023 }
 0xc26   :  { %v1376_v54 = vadd.f32 1.0, %v3024_v52 }
 0xc28   :  { %3027 = vrcp.f32 %v1376_v54 }
 0xc2f   :  { %v3026_v55 = vpop.eup %3025 }
 0xc30   :  { %v1283_v56 = vmul.f32 2.0, %v3026_v55  ;;  %v1285_v1 = vmul.f32 %v3026_v55, %v3469_v13 }
 0xc32   :  { %v2518_v57 = vadd.f32 -1.0, %v1283_v56 }
 0xc34   :  { %1287 = vrot.lane.b32.xlu1 %v2518_v57, %s3116_s22 }
 0xc35   :  { %v3028_v58 = vpop.eup %3027 }
 0xc36   :  { %v1379_v59 = vmul.f32 2.0, %v3028_v58  ;;  %v1381_v4 = vmul.f32 %v3028_v58, %v3473_v15 }
 0xc38   :  { %v2521_v47 = vadd.f32 -1.0, %v1379_v59 }
 0xc3a   :  { %1383 = vrot.lane.b32.xlu0 %v2521_v47, %s3116_s22 }
 0xca6   :  { %v1288_v60 = vpop.permute.xlu1 %1287 }
 0xca7   :  { %v1290_v61 = vmul.f32 %v3026_v55, %v1288_v60 }
 0xca9   :  { %1292 = vrot.lane.b32.xlu1 %v1290_v61, %s3117_s23 }
 0xcac   :  { %v1384_v62 = vpop.permute.xlu0 %1383 }
 0xcad   :  { %v1386_v63 = vmul.f32 %v3028_v58, %v1384_v62 }
 0xcaf   :  { %1388 = vrot.lane.b32.xlu0 %v1386_v63, %s3117_s23 }
 0xd1b   :  { %v1293_v44 = vpop.permute.xlu1 %1292 }
 0xd1c   :  { %v3521_v3 = vadd.f32 %v1293_v44, %v1285_v1 }
 0xd1e   :  { %3029 = vtanh.f32 %v3521_v3 }
 0xd21   :  { %v1389_v10 = vpop.permute.xlu0 %1388 }
 0xd22   :  { %v3525_v11 = vadd.f32 %v1389_v10, %v1381_v4 }
 0xd24   :  { %3031 = vtanh.f32 %v3525_v11 }
 0xd2b   :  { %v3030_v45 = vpop.eup %3029 }
 0xd2c   :  { %1298 = vrot.lane.b32.xlu1 %v3030_v45, %s3116_s22 }
 0xd31   :  { %v3032_v12 = vpop.eup %3031 }
 0xd32   :  { %1394 = vrot.lane.b32.xlu0 %v3032_v12, %s3116_s22 }
 0xd9e   :  { %v1299_v14 = vpop.permute.xlu1 %1298 }
 0xd9f   :  { %v1301_v13 = vmul.f32 %v3026_v55, %v1299_v14 }
 0xda1   :  { %1474 = vrot.lane.b32.xlu1 %v1301_v13, %s3117_s23 }
 0xda4   :  { %v1395_v8 = vpop.permute.xlu0 %1394 }
 0xda5   :  { %v1397_v16 = vmul.f32 %v3028_v58, %v1395_v8 }
 0xda7   :  { %1399 = vrot.lane.b32.xlu0 %v1397_v16, %s3117_s23 }
 0xe13   :  { %v1475_v15 = vpop.permute.xlu1 %1474 }
 0xe14   :  { %2860 = vmatmul.mubr.msk.f32.vlgmr.msra.gmra.mxu0 %vm215_vm3, %v1475_v15 }
 0xe15   :  { %2874 = vmatpush3.msra.mxu0 %v3236_v29  ;;  %2881 = vmatprep.mubr.msk.f32.mxu0 %vm3115_vm0, %v3114_v0 }
 0xe16   :  { %2875 = vmatprep.subr.mxu0 %v3114_v0 }
 0xe17   :  { %2876 = vmatpush3.msra.mxu0 %v3248_v31 }
 0xe18   :  { %2877 = vmatprep.subr.mxu0 %v3114_v0 }
 0xe19   :  { %v1400_v18 = vpop.permute.xlu0 %1399  ;;  %2878 = vmatpush3.msra.mxu0 %v3258_v33 }
 0xe1a   :  { %2849 = vmatmul.mubr.msk.f32.vlgmr.msra.gmra.mxu1 %vm215_vm3, %v1400_v18  ;;  %2879 = vmatprep.subr.mxu0 %v3114_v0 }
 0xe1b   :  { %2863 = vmatpush3.msra.mxu1 %v3177_v2  ;;  %2870 = vmatprep.mubr.msk.f32.mxu1 %vm3115_vm0, %v3114_v0 }
 0xe1c   :  { %2864 = vmatprep.subr.mxu1 %v3114_v0  ;;  %2880 = vmatpush3.msra.mxu0 %v3282_v37 }
 0xe1d   :  { %2865 = vmatpush3.msra.mxu1 %v3186_v5  ;;  %2895 = vmatprep.subr.mxu0 %v3114_v0 }
 0xe1e   :  { %2866 = vmatprep.subr.mxu1 %v3114_v0 }
 0xe1f   :  { %2867 = vmatpush3.msra.mxu1 %v3191_v6 }
 0xe20   :  { %2868 = vmatprep.subr.mxu1 %v3114_v0 }
 0xe21   :  { %2869 = vmatpush3.msra.mxu1 %v3196_v7 }
 0xe22   :  { %2871 = vmatmul.mubr.msk.f32.vlgmr.msra.gmra.mxu1 %vm215_vm3, %v1400_v18  ;;  %2884 = vmatprep.subr.mxu1 %v3114_v0 }
 0xe23   :  { %2885 = vmatpush3.msra.mxu1 %v3241_v30  ;;  %2892 = vmatprep.mubr.msk.f32.mxu1 %vm3115_vm0, %v3114_v0 }
 0xe24   :  { %2886 = vmatprep.subr.mxu1 %v3114_v0 }
 0xe25   :  { %2887 = vmatpush3.msra.mxu1 %v3268_v35 }
 0xe26   :  { %2888 = vmatprep.subr.mxu1 %v3114_v0 }
 0xe27   :  { %2889 = vmatpush3.msra.mxu1 %v3277_v36 }
 0xe28   :  { %2890 = vmatprep.subr.mxu1 %v3114_v0 }
 0xe29   :  { %2891 = vmatpush3.msra.mxu1 %v3294_v39 }
 0xe2a   :  { %2906 = vmatprep.subr.mxu1 %v3114_v0 }
 0xed4   :  { %v1544_v2 = vpop.f32.mrf.mxu0 }
 0xed6   :  { %v2861_v5 = vpop.f32.mrf.mxu0 }
 0xeda   :  { %v1469_v6 = vpop.f32.mrf.mxu1 }
 0xedb   :  { %v1545_v7 = vadd.f32 %v1544_v2, %v1469_v6 }
 0xedc   :  { %v2850_v19 = vpop.f32.mrf.mxu1 }
 0xedd   :  { %v1548_v17 = vadd.f32 %v3356_v53, %v1545_v7 }
 0xedf   :  { %v2524_v22 = vmul.f32 -1.442695, %v1548_v17 }
 0xee1   :  { %3033 = vpow2.f32 %v2524_v22 }
 0xee2   :  { %v1640_v20 = vpop.f32.mrf.mxu1 }
 0xee3   :  { %v1644_v26 = vadd.f32 %v1640_v20, %v183_v23 }
 0xee4   :  { %v2872_v21 = vpop.f32.mrf.mxu1 }
 0xee5   :  { %v2527_v27 = vmul.f32 -1.442695, %v1644_v26 }
 0xee7   :  { %3035 = vpow2.f32 %v2527_v27 }
 0xeee   :  { %v3034_v28 = vpop.eup %3033 }
 0xeef   :  { %v1552_v24 = vadd.f32 1.0, %v3034_v28 }
 0xef1   :  { %3037 = vrcp.f32 %v1552_v24 }
 0xef4   :  { %v3036_v32 = vpop.eup %3035 }
 0xef5   :  { %v1648_v34 = vadd.f32 1.0, %v3036_v32 }
 0xef7   :  { %3039 = vrcp.f32 %v1648_v34 }
 0xefe   :  { %v3038_v38 = vpop.eup %3037 }
 0xeff   :  { %v1555_v25 = vmul.f32 2.0, %v3038_v38  ;;  %v1557_v52 = vmul.f32 %v3038_v38, %v3521_v3  ;;  %v3594_v3 = vld [vmem:[#allocation2 + $0x18] sm:$0xff] }
 0xf01   :  { %v2525_v40 = vadd.f32 -1.0, %v1555_v25 }
 0xf03   :  { %1559 = vrot.lane.b32.xlu1 %v2525_v40, %s3116_s22 }
 0xf04   :  { %v3040_v41 = vpop.eup %3039 }
 0xf05   :  { %v1651_v42 = vmul.f32 2.0, %v3040_v41  ;;  %v1653_v56 = vmul.f32 %v3040_v41, %v3525_v11 }
 0xf07   :  { %v2528_v9 = vadd.f32 -1.0, %v1651_v42 }
 0xf09   :  { %1655 = vrot.lane.b32.xlu0 %v2528_v9, %s3116_s22 }
 0xf75   :  { %v1560_v46 = vpop.permute.xlu1 %1559 }
 0xf76   :  { %v1562_v43 = vmul.f32 %v3038_v38, %v1560_v46 }
 0xf78   :  { %1564 = vrot.lane.b32.xlu1 %v1562_v43, %s3117_s23  ;;  %v3080_v43 = vld [vmem:[%s3748_s4 + $0x18] sm:$0xff] }
 0xf7b   :  { %v1656_v50 = vpop.permute.xlu0 %1655 }
 0xf7c   :  { %v1658_v51 = vmul.f32 %v3040_v41, %v1656_v50  ;;  %v3081_v50 = vld [vmem:[%s3748_s4 + $0x10] sm:$0xff] }
 0xf7e   :  { %1660 = vrot.lane.b32.xlu0 %v1658_v51, %s3117_s23 }
 0xfea   :  { %v1565_v54 = vpop.permute.xlu1 %1564 }
 0xfeb   :  { %v3573_v55 = vadd.f32 %v1565_v54, %v1557_v52  ;;  %v3082_v52 = vld [vmem:[%s3748_s4 + $0x8] sm:$0xff]  ;;  %v3083_v54 = vld [vmem:[%s3748_s4] sm:$0xff] }
 0xfed   :  { %3041 = vtanh.f32 %v3573_v55 }
 0xff0   :  { %v1661_v57 = vpop.permute.xlu0 %1660 }
 0xff1   :  { %v3577_v58 = vadd.f32 %v1661_v57, %v1653_v56  ;;  %v3085_v56 = vld [vmem:[%s3749_s5 + $0x10] sm:$0xff]  ;;  %v3086_v57 = vld [vmem:[%s3749_s5 + $0x8] sm:$0xff] }
 0xff3   :  { %3043 = vtanh.f32 %v3577_v58 }
 0xffa   :  { %v3042_v59 = vpop.eup %3041 }
 0xffb   :  { %1570 = vrot.lane.b32.xlu1 %v3042_v59, %s3116_s22 }
0x1000   :  { %v3044_v47 = vpop.eup %3043 }
0x1001   :  { %1666 = vrot.lane.b32.xlu0 %v3044_v47, %s3116_s22 }
0x106d   :  { %v1571_v60 = vpop.permute.xlu1 %1570 }
0x106e   :  { %v1573_v61 = vmul.f32 %v3038_v38, %v1571_v60 }
0x1070   :  { %1746 = vrot.lane.b32.xlu1 %v1573_v61, %s3117_s23 }
0x1073   :  { %v1667_v62 = vpop.permute.xlu0 %1666 }
0x1074   :  { %v1669_v63 = vmul.f32 %v3040_v41, %v1667_v62 }
0x1076   :  { %1671 = vrot.lane.b32.xlu0 %v1669_v63, %s3117_s23 }
0x10e2   :  { %v1747_v1 = vpop.permute.xlu1 %1746 }
0x10e3   :  { %2893 = vmatmul.mubr.msk.f32.vlgmr.msra.gmra.mxu1 %vm215_vm3, %v1747_v1 }
0x10e4   :  { %2907 = vmatpush3.msra.mxu1 %v3236_v29  ;;  %2914 = vmatprep.mubr.msk.f32.mxu1 %vm3115_vm0, %v3114_v0  ;;  %v3601_v29 = vld [vmem:[#allocation2 + $0x10] sm:$0xff] }
0x10e5   :  { %2908 = vmatprep.subr.mxu1 %v3114_v0 }
0x10e6   :  { %2909 = vmatpush3.msra.mxu1 %v3248_v31  ;;  %v3606_v31 = vld [vmem:[#allocation2 + $0x8] sm:$0xff] }
0x10e7   :  { %2910 = vmatprep.subr.mxu1 %v3114_v0 }
0x10e8   :  { %v1672_v44 = vpop.permute.xlu0 %1671  ;;  %2911 = vmatpush3.msra.mxu1 %v3258_v33  ;;  %v3610_v33 = vld [vmem:[#allocation2] sm:$0xff] }
0x10e9   :  { %2882 = vmatmul.mubr.msk.f32.vlgmr.msra.gmra.mxu0 %vm215_vm3, %v1672_v44  ;;  %2912 = vmatprep.subr.mxu1 %v3114_v0 }
0x10ea   :  { %2896 = vmatpush3.msra.mxu0 %v3594_v3  ;;  %2903 = vmatprep.mubr.msk.f32.mxu0 %vm3115_vm0, %v3114_v0 }
0x10eb   :  { %2897 = vmatprep.subr.mxu0 %v3114_v0  ;;  %2913 = vmatpush3.msra.mxu1 %v3282_v37 }
0x10ec   :  { %2898 = vmatpush3.msra.mxu0 %v3601_v29  ;;  %2928 = vmatprep.subr.mxu1 %v3114_v0 }
0x10ed   :  { %2899 = vmatprep.subr.mxu0 %v3114_v0 }
0x10ee   :  { %2900 = vmatpush3.msra.mxu0 %v3606_v31 }
0x10ef   :  { %2901 = vmatprep.subr.mxu0 %v3114_v0 }
0x10f0   :  { %2902 = vmatpush3.msra.mxu0 %v3610_v33 }
0x10f1   :  { %2904 = vmatmul.mubr.msk.f32.vlgmr.msra.gmra.mxu0 %vm215_vm3, %v1672_v44  ;;  %2917 = vmatprep.subr.mxu0 %v3114_v0 }
0x10f2   :  { %2918 = vmatpush3.msra.mxu0 %v3241_v30  ;;  %2925 = vmatprep.mubr.msk.f32.mxu0 %vm3115_vm0, %v3114_v0 }
0x10f3   :  { %2919 = vmatprep.subr.mxu0 %v3114_v0 }
0x10f4   :  { %2920 = vmatpush3.msra.mxu0 %v3268_v35  ;;  %v3629_v35 = vld [vmem:[%s3746_s2] ss:$0 sm:$0xff] }
0x10f5   :  { %2921 = vmatprep.subr.mxu0 %v3114_v0  ;;  %v193_v44 = vadd.f32 %v3629_v35, %v3349_v48 }
0x10f6   :  { %2922 = vmatpush3.msra.mxu0 %v3277_v36  ;;  %v188_v36 = vadd.f32 %v3629_v35, %v3351_v49 }
0x10f7   :  { %2923 = vmatprep.subr.mxu0 %v3114_v0 }
0x10f8   :  { %2924 = vmatpush3.msra.mxu0 %v3294_v39 }
0x10f9   :  { %2939 = vmatprep.subr.mxu0 %v3114_v0 }
0x11a3   :  { %v1816_v37 = vpop.f32.mrf.mxu1 }
0x11a5   :  { %v2894_v4 = vpop.f32.mrf.mxu1 }
0x11a9   :  { %v1741_v30 = vpop.f32.mrf.mxu0 }
0x11aa   :  { %v1817_v10 = vadd.f32 %v1816_v37, %v1741_v30 }
0x11ab   :  { %v2883_v11 = vpop.f32.mrf.mxu0 }
0x11ac   :  { %v1820_v45 = vadd.f32 %v3356_v53, %v1817_v10 }
0x11ae   :  { %v2531_v12 = vmul.f32 -1.442695, %v1820_v45 }
0x11b0   :  { %3045 = vpow2.f32 %v2531_v12 }
0x11b1   :  { %v1912_v39 = vpop.f32.mrf.mxu0 }
0x11b2   :  { %v1916_v14 = vadd.f32 %v1912_v39, %v188_v36 }
0x11b3   :  { %v2905_v13 = vpop.f32.mrf.mxu0 }
0x11b4   :  { %v2534_v8 = vmul.f32 -1.442695, %v1916_v14 }
0x11b6   :  { %3047 = vpow2.f32 %v2534_v8 }
0x11bd   :  { %v3046_v16 = vpop.eup %3045 }
0x11be   :  { %v1824_v15 = vadd.f32 1.0, %v3046_v16 }
0x11c0   :  { %3049 = vrcp.f32 %v1824_v15 }
0x11c3   :  { %v3048_v18 = vpop.eup %3047 }
0x11c4   :  { %v1920_v2 = vadd.f32 1.0, %v3048_v18 }
0x11c6   :  { %3051 = vrcp.f32 %v1920_v2 }
0x11cd   :  { %v3050_v5 = vpop.eup %3049 }
0x11ce   :  { %v1827_v6 = vmul.f32 2.0, %v3050_v5  ;;  %v1829_v21 = vmul.f32 %v3050_v5, %v3573_v55  ;;  %v3084_v55 = vld [vmem:[%s3749_s5 + $0x18] sm:$0xff] }
0x11d0   :  { %v2532_v7 = vadd.f32 -1.0, %v1827_v6 }
0x11d2   :  { %1831 = vrot.lane.b32.xlu1 %v2532_v7, %s3116_s22 }
0x11d3   :  { %v3052_v19 = vpop.eup %3051 }
0x11d4   :  { %v1923_v17 = vmul.f32 2.0, %v3052_v19  ;;  %v1925_v24 = vmul.f32 %v3052_v19, %v3577_v58  ;;  %v3087_v58 = vld [vmem:[%s3749_s5] sm:$0xff] }
0x11d6   :  { %v2535_v49 = vadd.f32 -1.0, %v1923_v17 }
0x11d8   :  { %1927 = vrot.lane.b32.xlu0 %v2535_v49, %s3116_s22 }
0x1244   :  { %v1832_v22 = vpop.permute.xlu1 %1831 }
0x1245   :  { %v1834_v23 = vmul.f32 %v3050_v5, %v1832_v22 }
0x1247   :  { %1836 = vrot.lane.b32.xlu1 %v1834_v23, %s3117_s23 }
0x124a   :  { %v1928_v20 = vpop.permute.xlu0 %1927 }
0x124b   :  { %v1930_v26 = vmul.f32 %v3052_v19, %v1928_v20 }
0x124d   :  { %1932 = vrot.lane.b32.xlu0 %v1930_v26, %s3117_s23 }
0x12b9   :  { %v1837_v27 = vpop.permute.xlu1 %1836 }
0x12ba   :  { %v3638_v28 = vadd.f32 %v1837_v27, %v1829_v21 }
0x12bc   :  { %3053 = vtanh.f32 %v3638_v28 }
0x12bf   :  { %v1933_v32 = vpop.permute.xlu0 %1932 }
0x12c0   :  { %v3642_v34 = vadd.f32 %v1933_v32, %v1925_v24  ;;  %v3088_v32 = vld [vmem:[%s3750_s6] ss:$0 sm:$0xff] }
0x12c2   :  { %3055 = vtanh.f32 %v3642_v34 }
0x12c9   :  { %v3054_v38 = vpop.eup %3053 }
0x12ca   :  { %1842 = vrot.lane.b32.xlu1 %v3054_v38, %s3116_s22 }
0x12cf   :  { %v3056_v25 = vpop.eup %3055 }
0x12d0   :  { %1938 = vrot.lane.b32.xlu0 %v3056_v25, %s3116_s22 }
0x133c   :  { %v1843_v40 = vpop.permute.xlu1 %1842 }
0x133d   :  { %v1845_v41 = vmul.f32 %v3050_v5, %v1843_v40 }
0x133f   :  { %2018 = vrot.lane.b32.xlu1 %v1845_v41, %s3117_s23 }
0x1342   :  { %v1939_v42 = vpop.permute.xlu0 %1938 }
0x1343   :  { %v1941_v9 = vmul.f32 %v3052_v19, %v1939_v42 }
0x1345   :  { %1943 = vrot.lane.b32.xlu0 %v1941_v9, %s3117_s23 }
0x13b1   :  { %v2019_v46 = vpop.permute.xlu1 %2018 }
0x13b2   :  { %2926 = vmatmul.mubr.msk.f32.vlgmr.msra.gmra.mxu0 %vm215_vm3, %v2019_v46 }
0x13b3   :  { %2940 = vmatpush3.msra.mxu0 %v3080_v43  ;;  %2947 = vmatprep.mubr.msk.f32.mxu0 %vm3115_vm0, %v3114_v0 }
0x13b4   :  { %2941 = vmatprep.subr.mxu0 %v3114_v0 }
0x13b5   :  { %2942 = vmatpush3.msra.mxu0 %v3081_v50 }
0x13b6   :  { %2943 = vmatprep.subr.mxu0 %v3114_v0 }
0x13b7   :  { %v1944_v51 = vpop.permute.xlu0 %1943  ;;  %2944 = vmatpush3.msra.mxu0 %v3082_v52 }
0x13b8   :  { %2915 = vmatmul.mubr.msk.f32.vlgmr.msra.gmra.mxu1 %vm215_vm3, %v1944_v51  ;;  %2945 = vmatprep.subr.mxu0 %v3114_v0 }
0x13b9   :  { %2929 = vmatpush3.msra.mxu1 %v3594_v3  ;;  %2936 = vmatprep.mubr.msk.f32.mxu1 %vm3115_vm0, %v3114_v0 }
0x13ba   :  { %2930 = vmatprep.subr.mxu1 %v3114_v0  ;;  %2946 = vmatpush3.msra.mxu0 %v3083_v54  ;;  %v2393_v54 = vld [vmem:[%s3751_s7 + $0x18] sm:$0xff] }
0x13bb   :  { %2931 = vmatpush3.msra.mxu1 %v3601_v29  ;;  %2961 = vmatprep.subr.mxu0 %v3114_v0 }
0x13bc   :  { %2932 = vmatprep.subr.mxu1 %v3114_v0 }
0x13bd   :  { %2933 = vmatpush3.msra.mxu1 %v3606_v31 }
0x13be   :  { %2934 = vmatprep.subr.mxu1 %v3114_v0 }
0x13bf   :  { %2935 = vmatpush3.msra.mxu1 %v3610_v33 }
0x13c0   :  { %2937 = vmatmul.mubr.msk.f32.vlgmr.msra.gmra.mxu1 %vm215_vm3, %v1944_v51  ;;  %2950 = vmatprep.subr.mxu1 %v3114_v0 }
0x13c1   :  { %2951 = vmatpush3.msra.mxu1 %v3084_v55  ;;  %2958 = vmatprep.mubr.msk.f32.mxu1 %vm3115_vm0, %v3114_v0  ;;  %v2392_v55 = vld [vmem:[%s3751_s7 + $0x10] sm:$0xff] }
0x13c2   :  { %2952 = vmatprep.subr.mxu1 %v3114_v0 }
0x13c3   :  { %2953 = vmatpush3.msra.mxu1 %v3085_v56  ;;  %v2391_v56 = vld [vmem:[%s3751_s7 + $0x8] sm:$0xff] }
0x13c4   :  { %2954 = vmatprep.subr.mxu1 %v3114_v0 }
0x13c5   :  { %2955 = vmatpush3.msra.mxu1 %v3086_v57  ;;  %v2390_v57 = vld [vmem:[%s3751_s7] sm:$0xff] }
0x13c6   :  { %2956 = vmatprep.subr.mxu1 %v3114_v0 }
0x13c7   :  { %2957 = vmatpush3.msra.mxu1 %v3087_v58 }
0x1472   :  { %v2088_v59 = vpop.f32.mrf.mxu0 }
0x1474   :  { %v2927_v47 = vpop.f32.mrf.mxu0 }
0x1478   :  { %v2013_v60 = vpop.f32.mrf.mxu1 }
0x1479   :  { %v2089_v61 = vadd.f32 %v2088_v59, %v2013_v60 }
0x147a   :  { %v2916_v62 = vpop.f32.mrf.mxu1 }
0x147b   :  { %v2092_v63 = vadd.f32 %v3356_v53, %v2089_v61  ;;  %v2547_v61 = vld [vmem:[%s3752_s8] ss:$0 sm:$0xff] }
0x147d   :  { %v2538_v1 = vmul.f32 -1.442695, %v2092_v63 }
0x147f   :  { %3057 = vpow2.f32 %v2538_v1 }
0x1480   :  { %v2184_v3 = vpop.f32.mrf.mxu1 }
0x1481   :  { %v2188_v29 = vadd.f32 %v2184_v3, %v193_v44 }
0x1482   :  { %v2938_v31 = vpop.f32.mrf.mxu1 }
0x1483   :  { %v2541_v33 = vmul.f32 -1.442695, %v2188_v29 }
0x1485   :  { %3059 = vpow2.f32 %v2541_v33 }
0x148c   :  { %v3058_v37 = vpop.eup %3057 }
0x148d   :  { %v2096_v4 = vadd.f32 1.0, %v3058_v37 }
0x148f   :  { %3061 = vrcp.f32 %v2096_v4 }
0x1492   :  { %v3060_v30 = vpop.eup %3059 }
0x1493   :  { %v2192_v10 = vadd.f32 1.0, %v3060_v30 }
0x1495   :  { %3063 = vrcp.f32 %v2192_v10 }
0x149c   :  { %v3062_v11 = vpop.eup %3061 }
0x149d   :  { %v2099_v45 = vmul.f32 2.0, %v3062_v11  ;;  %v2101_v8 = vmul.f32 %v3062_v11, %v3638_v28 }
0x149f   :  { %v2539_v12 = vadd.f32 -1.0, %v2099_v45 }
0x14a1   :  { %2103 = vrot.lane.b32.xlu0 %v2539_v12, %s3116_s22 }
0x14a2   :  { %v3064_v53 = vpop.eup %3063 }
0x14a3   :  { %v2195_v36 = vmul.f32 2.0, %v3064_v53  ;;  %v2197_v18 = vmul.f32 %v3064_v53, %v3642_v34 }
0x14a5   :  { %v2542_v48 = vadd.f32 -1.0, %v2195_v36 }
0x14a7   :  { %2199 = vrot.lane.b32.xlu1 %v2542_v48, %s3116_s22 }
0x1513   :  { %v2104_v35 = vpop.permute.xlu0 %2103 }
0x1514   :  { %v2106_v39 = vmul.f32 %v3062_v11, %v2104_v35 }
0x1516   :  { %2108 = vrot.lane.b32.xlu0 %v2106_v39, %s3117_s23 }
0x1519   :  { %v2200_v14 = vpop.permute.xlu1 %2199 }
0x151a   :  { %v2202_v13 = vmul.f32 %v3064_v53, %v2200_v14 }
0x151c   :  { %2204 = vrot.lane.b32.xlu1 %v2202_v13, %s3117_s23 }
0x1588   :  { %v2109_v16 = vpop.permute.xlu0 %2108 }
0x1589   :  { %v2111_v15 = vadd.f32 %v2109_v16, %v2101_v8 }
0x158b   :  { %3065 = vtanh.f32 %v2111_v15 }
0x158e   :  { %v2205_v2 = vpop.permute.xlu1 %2204 }
0x158f   :  { %v2207_v5 = vadd.f32 %v2205_v2, %v2197_v18 }
0x1591   :  { %3067 = vtanh.f32 %v2207_v5 }
0x1598   :  { %v3066_v6 = vpop.eup %3065 }
0x1599   :  { %2114 = vrot.lane.b32.xlu0 %v3066_v6, %s3116_s22 }
0x159e   :  { %v3068_v7 = vpop.eup %3067 }
0x159f   :  { %2210 = vrot.lane.b32.xlu1 %v3068_v7, %s3116_s22 }
0x160b   :  { %v2115_v19 = vpop.permute.xlu0 %2114 }
0x160c   :  { %v2117_v17 = vmul.f32 %v3062_v11, %v2115_v19 }
0x160e   :  { %2290 = vrot.lane.b32.xlu1 %v2117_v17, %s3117_s23 }
0x1611   :  { %v2211_v49 = vpop.permute.xlu1 %2210 }
0x1612   :  { %v2213_v22 = vmul.f32 %v3064_v53, %v2211_v49 }
0x1614   :  { %2215 = vrot.lane.b32.xlu0 %v2213_v22, %s3117_s23 }
0x1680   :  { %v2291_v23 = vpop.permute.xlu1 %2290 }
0x1681   :  { %2959 = vmatmul.mubr.msk.f32.vlgmr.msra.gmra.mxu1 %vm215_vm3, %v2291_v23 }
0x1686   :  { %v2216_v20 = vpop.permute.xlu0 %2215 }
0x1687   :  { %2948 = vmatmul.mubr.msk.f32.vlgmr.msra.gmra.mxu0 %vm215_vm3, %v2216_v20 }
0x1688   :  { %2969 = vmatprep.mubr.msk.f32.mxu0 %vm3115_vm0, %v3114_v0  ;;  %2962 = vmatpush3.msra.mxu0 %v2393_v54 }
0x1689   :  { %2963 = vmatprep.subr.mxu0 %v3114_v0 }
0x168a   :  { %2964 = vmatpush3.msra.mxu0 %v2392_v55 }
0x168b   :  { %2965 = vmatprep.subr.mxu0 %v3114_v0 }
0x168c   :  { %2966 = vmatpush3.msra.mxu0 %v2391_v56 }
0x168d   :  { %2967 = vmatprep.subr.mxu0 %v3114_v0 }
0x168e   :  { %2968 = vmatpush3.msra.mxu0 %v2390_v57 }
0x1741   :  { %v2360_v26 = vpop.f32.mrf.mxu1 }
0x1743   :  { %v2960_v21 = vpop.f32.mrf.mxu1 }
0x1747   :  { %v2285_v27 = vpop.f32.mrf.mxu0 }
0x1748   :  { %v2361_v28 = vadd.f32 %v2360_v26, %v2285_v27 }
0x1749   :  { %v2949_v24 = vpop.f32.mrf.mxu0 }
0x174a   :  { %v2364_v34 = vadd.f32 %v3088_v32, %v2361_v28 }
0x174c   :  { %v2545_v38 = vmul.f32 -1.442695, %v2364_v34 }
0x174e   :  { %3069 = vpow2.f32 %v2545_v38 }
0x175b   :  { %v3070_v25 = vpop.eup %3069 }
0x175c   :  { %v2368_v40 = vadd.f32 1.0, %v3070_v25 }
0x175e   :  { %3071 = vrcp.f32 %v2368_v40 }
0x176b   :  { %v3072_v41 = vpop.eup %3071 }
0x176c   :  { %v2371_v42 = vmul.f32 2.0, %v3072_v41  ;;  %v2373_v50 = vmul.f32 %v3072_v41, %v2111_v15 }
0x176e   :  { %v2546_v9 = vadd.f32 -1.0, %v2371_v42 }
0x1770   :  { %2375 = vrot.lane.b32.xlu0 %v2546_v9, %s3116_s22 }
0x17e2   :  { %v2376_v46 = vpop.permute.xlu0 %2375 }
0x17e3   :  { %v2378_v43 = vmul.f32 %v3072_v41, %v2376_v46 }
0x17e5   :  { %2380 = vrot.lane.b32.xlu1 %v2378_v43, %s3117_s23 }
0x1857   :  { %v2381_v51 = vpop.permute.xlu1 %2380 }
0x1858   :  { %v2383_v52 = vadd.f32 %v2381_v51, %v2373_v50 }
0x185a   :  { %3073 = vtanh.f32 %v2383_v52 }
0x1867   :  { %v3074_v58 = vpop.eup %3073 }
0x1868   :  { %2386 = vrot.lane.b32.xlu0 %v3074_v58, %s3116_s22 }
0x18da   :  { %v2387_v59 = vpop.permute.xlu0 %2386 }
0x18db   :  { %v2389_v47 = vmul.f32 %v3072_v41, %v2387_v59 }
0x18dd   :  { %2402 = vrot.lane.b32.xlu1 %v2389_v47, %s3117_s23 }
0x194f   :  { %v2403_v60 = vpop.permute.xlu1 %2402 }
0x1950   :  { %2970 = vmatmul.mubr.msk.f32.vlgmr.msra.gmra.mxu0 %vm215_vm3, %v2403_v60 }
0x1a10   :  { %v2472_v62 = vpop.f32.mrf.mxu0 }
0x1a11   :  { %v2473_v63 = vadd.f32 %v2547_v61, %v2472_v62 }
0x1a12   :  { %v2971_v1 = vpop.f32.mrf.mxu0 }
0x1a13   :  { %2476 = vst.msk [vmem:[%s3753_s9] sm:$0xff] %vm62_vm2, %v2473_v63 }
0x1a14   :  { %2481 = vsyncpa [#allocation3], 1 }

</bundles_post_ra>
